<compile_context>
chip_gen: v6e
topology: v6e:2x2x1
jax: 0.10.0
libtpu: 0.0.40
codegen_flags: <defaults>
</compile_context>

<pallas_src>
import jax
import jax.numpy as jnp
from jax.experimental import pallas as pl
from jax.experimental.pallas import tpu as pltpu


def _round_up(x, m):
    return (x + m - 1) // m * m


def _largest_divisor_at_most(n, cap):
    cap = max(1, min(cap, n))
    for d in range(cap, 0, -1):
        if n % d == 0:
            return d
    return 1


def _make_basic_conv_kernel(KH, KW, CIN_P, COUT_P, TH, WO, STRIDE, out_dtype):
    """Kernel closed over static conv geometry. Computes one (TH, WO, COUT_P) output row tile."""
    TH_IN = (TH - 1) * STRIDE + KH      # input rows needed per output row tile (with halo)
    M = TH * WO                         # MXU M dim (multiple of 8, sublane-friendly)

    def kernel(x_ref, w_ref, scale_ref, bias_ref, o_ref, acc_ref):
        # x_ref:      (1, Hp, Wp, CIN_P)      padded image of this batch element (resident)
        # w_ref:      (KH, KW, CIN_P, COUT_P) zero-padded weights
        # scale/bias: (1, COUT_P)             folded eval-mode BatchNorm affine (f32)
        # o_ref:      (1, TH, WO, COUT_P)     lane-dense output row tile
        # acc_ref:    (M, COUT_P) f32         VMEM scratch accumulator
        t = pl.program_id(1)
        r0 = pl.multiple_of(t * (TH * STRIDE), TH * STRIDE)   # first padded input row of tile

        if STRIDE != 1:
            # TODO(synk): stride-2 layers should use a space-to-depth re-layout in the wrapper
            # (stride-1 conv with 4x contraction depth) instead of strided sublane slices.
            slab = x_ref[0, pl.ds(r0, TH_IN)]                 # (TH_IN, Wp, CIN_P)

        def tap_patch(kh, kw):
            if STRIDE == 1:
                return x_ref[0, pl.ds(r0 + kh, TH), pl.ds(kw, WO), :]
            return jax.lax.slice(
                slab,
                (kh, kw, 0),
                (kh + (TH - 1) * STRIDE + 1, kw + (WO - 1) * STRIDE + 1, CIN_P),
                (STRIDE, STRIDE, 1))

        # Direct convolution: one explicit 2D MXU matmul per tap, accumulated in VMEM scratch.
        first = True
        for kh in range(KH):
            for kw in range(KW):
                patch2d = tap_patch(kh, kw).reshape(M, CIN_P)            # (M, CIN_P)
                contrib = jnp.dot(patch2d, w_ref[kh, kw],
                                  preferred_element_type=jnp.float32)    # (M, COUT_P)
                if first:
                    acc_ref[...] = contrib
                    first = False
                else:
                    acc_ref[...] += contrib

        # Fused eval-mode BatchNorm (folded scale/bias) + Mish, f32, lane-dense epilogue.
        y = acc_ref[...] * scale_ref[...] + bias_ref[...]                # (M, COUT_P)
        # mish(y) = y * tanh(softplus(y)) = y * ((1+e)^2 - 1) / ((1+e)^2 + 1),  e = exp(y).
        # Clamp: for y > 20, tanh(softplus(y)) == 1 to f32 precision, so mish(y) = y.
        yc = jnp.minimum(y, 20.0)
        e = jnp.exp(yc)                                                  # 1 EUP transcendental
        t2 = (1.0 + e) * (1.0 + e)
        den = t2 + 1.0
        r = pl.reciprocal(den, approx=True)                              # EUP approx reciprocal
        r = r * (2.0 - den * r)                                          # 1 Newton step -> ~f32
        ratio = (t2 - 1.0) * r
        o_ref[0] = (y * ratio).reshape(TH, WO, COUT_P).astype(out_dtype)

    return kernel


def basic_conv(x_nchw, w_oihw, gamma, beta, running_mean, running_var,
               stride=1, eps=1e-5, row_tile=None, compute_dtype=None):
    """Forward pass of BasicConv: Conv2d(pad=k//2, bias=False) -> BatchNorm2d(eval) -> Mish.

    Inputs in PyTorch layout (NCHW / OIHW); returns NCHW.
    compute_dtype=jnp.bfloat16 casts x/w for the MXU (f32 accumulation kept) — v5e-friendly.
    """
    B, Cin, H, W = x_nchw.shape
    Cout, Cin_w, KH, KW = w_oihw.shape
    assert Cin == Cin_w
    pad_h, pad_w = KH // 2, KW // 2           # nn.Conv2d(padding=kernel_size // 2), per-dim

    HO = (H + 2 * pad_h - KH) // stride + 1
    WO = (W + 2 * pad_w - KW) // stride + 1
    Hp, Wp = H + 2 * pad_h, W + 2 * pad_w

    CIN_P = _round_up(Cin, 8)                 # sublane-friendly contraction depth
    COUT_P = _round_up(Cout, 128)             # lane-dense output channels

    out_dtype = x_nchw.dtype
    in_dtype = compute_dtype if compute_dtype is not None else x_nchw.dtype

    # --- glue (plain JAX): layout conversion, zero padding, BN folding ---
    x = jnp.transpose(x_nchw, (0, 2, 3, 1)).astype(in_dtype)             # NCHW -> NHWC
    x = jnp.pad(x, ((0, 0), (pad_h, pad_h), (pad_w, pad_w), (0, CIN_P - Cin)))
    w = jnp.transpose(w_oihw, (2, 3, 1, 0)).astype(in_dtype)             # OIHW -> (KH,KW,Ci,Co)
    w = jnp.pad(w, ((0, 0), (0, 0), (0, CIN_P - Cin), (0, COUT_P - Cout)))

    scale = (gamma / jnp.sqrt(running_var + eps)).astype(jnp.float32)
    bias = beta.astype(jnp.float32) - running_mean.astype(jnp.float32) * scale
    scale = jnp.pad(scale, (0, COUT_P - Cout)).reshape(1, COUT_P)
    bias = jnp.pad(bias, (0, COUT_P - Cout)).reshape(1, COUT_P)

    # Row tile: largest divisor of HO giving roughly M = TH*WO ~ 512 MXU rows per step while
    # keeping the per-step accumulator / output block small (VMEM-friendly on v7x).
    if row_tile is not None and HO % row_tile == 0:
        TH = row_tile
    else:
        TH = _largest_divisor_at_most(HO, max(8, 512 // max(WO, 1)))
    n_row_tiles = HO // TH

    kernel = _make_basic_conv_kernel(KH, KW, CIN_P, COUT_P, TH, WO, stride, out_dtype)

    out_padded = pl.pallas_call(
        kernel,
        out_shape=jax.ShapeDtypeStruct((B, HO, WO, COUT_P), out_dtype),
        grid=(B, n_row_tiles),
        in_specs=[
            pl.BlockSpec((1, Hp, Wp, CIN_P), lambda b, t: (b, 0, 0, 0)),
            pl.BlockSpec((KH, KW, CIN_P, COUT_P), lambda b, t: (0, 0, 0, 0)),
            pl.BlockSpec((1, COUT_P), lambda b, t: (0, 0)),
            pl.BlockSpec((1, COUT_P), lambda b, t: (0, 0)),
        ],
        out_specs=pl.BlockSpec((1, TH, WO, COUT_P), lambda b, t: (b, t, 0, 0)),
        scratch_shapes=[pltpu.VMEM((TH * WO, COUT_P), jnp.float32)],
        compiler_params=pltpu.CompilerParams(
            dimension_semantics=("parallel", "parallel"),
            vmem_limit_bytes=32 * 1024 * 1024,
        ),
    )(x, w, scale, bias)

    out_nhwc = out_padded[..., :Cout]                                    # drop channel padding
    return jnp.transpose(out_nhwc, (0, 3, 1, 2))                         # NHWC -> NCHW


def _reference(x_nchw, w_oihw, gamma, beta, mean, var, stride=1, eps=1e-5):
    """Pure-JAX reference matching the PyTorch module (eval-mode BN)."""
    KH, KW = w_oihw.shape[2], w_oihw.shape[3]
    y = jax.lax.conv_general_dilated(
        x_nchw, w_oihw, window_strides=(stride, stride),
        padding=((KH // 2, KH // 2), (KW // 2, KW // 2)),
        dimension_numbers=("NCHW", "OIHW", "NCHW"),
    )
    scale = (gamma / jnp.sqrt(var + eps)).reshape(1, -1, 1, 1)
    shift = (beta - mean * gamma / jnp.sqrt(var + eps)).reshape(1, -1, 1, 1)
    y = y * scale + shift
    return y * jnp.tanh(jnp.log1p(jnp.exp(y)))


if __name__ == "__main__":
    key = jax.random.PRNGKey(0)
    k_x, k_w, k_g, k_b, k_m, k_v = jax.random.split(key, 6)

    # BasicConv(in_channels=4, out_channels=8, kernel_size=3, stride=1)
    B, Cin, H, W = 2, 4, 16, 16
    Cout, K, stride = 8, 3, 1

    x = jax.random.normal(k_x, (B, Cin, H, W), dtype=jnp.float32)
    w = jax.random.normal(k_w, (Cout, Cin, K, K), dtype=jnp.float32) * 0.1
    gamma = 1.0 + 0.1 * jax.random.normal(k_g, (Cout,), dtype=jnp.float32)
    beta = 0.1 * jax.random.normal(k_b, (Cout,), dtype=jnp.float32)
    running_mean = 0.1 * jax.random.normal(k_m, (Cout,), dtype=jnp.float32)
    running_var = jax.random.uniform(k_v, (Cout,), dtype=jnp.float32,
                                     minval=0.5, maxval=1.5)

    ref = _reference(x, w, gamma, beta, running_mean, running_var, stride=stride)

    # f32 path (matches PyTorch numerics; row_tile=8 exercises the spatial-tiling/halo path).
    out = basic_conv(x, w, gamma, beta, running_mean, running_var,
                     stride=stride, row_tile=8)
    out = jax.block_until_ready(out)
    assert out.shape == (B, Cout, H, W), out.shape
    err = float(jnp.max(jnp.abs(out - ref)))
    assert err < 2e-3, err

    # bf16 inputs with f32 MXU accumulation (v5e-friendly); looser tolerance for bf16 rounding.
    out_bf16 = basic_conv(x, w, gamma, beta, running_mean, running_var,
                          stride=stride, row_tile=8, compute_dtype=jnp.bfloat16)
    out_bf16 = jax.block_until_ready(out_bf16)
    err_bf16 = float(jnp.max(jnp.abs(out_bf16 - ref)))
    assert err_bf16 < 5e-2, err_bf16

    print("KERNEL_OK")
</pallas_src>

<mosaic_0001>
module attributes {stable_mosaic.version = 11 : i64} {
  func.func @kernel(%arg0: i32, %arg1: i32, %arg2: memref<1x18x18x8xf32, #tpu.memory_space<vmem>>, %arg3: memref<3x3x8x128xf32, #tpu.memory_space<vmem>>, %arg4: memref<1x128xf32, #tpu.memory_space<vmem>>, %arg5: memref<1x128xf32, #tpu.memory_space<vmem>>, %arg6: memref<1x8x16x128xf32, #tpu.memory_space<vmem>>, %arg7: memref<128x128xf32, #tpu.memory_space<vmem>>) attributes {dimension_semantics = [#tpu.dimension_semantics<parallel>, #tpu.dimension_semantics<parallel>], iteration_bounds = array<i64: 2, 2>, scalar_prefetch = 0 : i64, scratch_operands = 1 : i64, tpu.core_type = #tpu.core_type<tc>, window_params = [{transform_indices = @transform_0, window_bounds = array<i64: 1, 18, 18, 8>}, {pipeline_mode = #tpu.pipeline_mode<synchronous>, transform_indices = @transform_1, window_bounds = array<i64: 3, 3, 8, 128>}, {pipeline_mode = #tpu.pipeline_mode<synchronous>, transform_indices = @transform_2, window_bounds = array<i64: 1, 128>}, {pipeline_mode = #tpu.pipeline_mode<synchronous>, transform_indices = @transform_3, window_bounds = array<i64: 1, 128>}, {transform_indices = @transform_4, window_bounds = array<i64: 1, 8, 16, 128>}]} {
    %c8_i32 = arith.constant 8 : i32
    %0 = arith.muli %arg1, %c8_i32 : i32
    %1 = tpu.assume_multiple %0, 8 : i32
    %c0_i32 = arith.constant 0 : i32
    %2 = arith.addi %1, %c0_i32 : i32
    %c0 = arith.constant 0 : index
    %3 = arith.index_cast %2 : i32 to index
    %c0_0 = arith.constant 0 : index
    %c0_1 = arith.constant 0 : index
    %4 = vector.load %arg2[%c0, %3, %c0_0, %c0_1] : memref<1x18x18x8xf32, #tpu.memory_space<vmem>>, vector<1x8x16x8xf32>
    %5 = vector.shape_cast %4 : vector<1x8x16x8xf32> to vector<8x16x8xf32>
    %6 = vector.shape_cast %5 : vector<8x16x8xf32> to vector<128x8xf32>
    %c0_2 = arith.constant 0 : index
    %c0_3 = arith.constant 0 : index
    %c0_4 = arith.constant 0 : index
    %c0_5 = arith.constant 0 : index
    %7 = vector.load %arg3[%c0_2, %c0_3, %c0_4, %c0_5] : memref<3x3x8x128xf32, #tpu.memory_space<vmem>>, vector<1x1x8x128xf32>
    %8 = vector.shape_cast %7 : vector<1x1x8x128xf32> to vector<8x128xf32>
    %cst = arith.constant dense<0.000000e+00> : vector<128x128xf32>
    %9 = tpu.matmul %6, %8, %cst {dimension_numbers = #tpu.dot_dimension_numbers<[1], [0], [0], [1], [0, 0, 1, 1], [], []>} : vector<128x8xf32>, vector<8x128xf32>, vector<128x128xf32> -> vector<128x128xf32>
    %c0_6 = arith.constant 0 : index
    %c0_7 = arith.constant 0 : index
    %10 = vector.load %arg7[%c0_6, %c0_7] : memref<128x128xf32, #tpu.memory_space<vmem>>, vector<128x128xf32>
    tpu.vector_store %arg7[%c0_6, %c0_7], %9 {strides = array<i32>} : memref<128x128xf32, #tpu.memory_space<vmem>>, vector<128x128xf32>,
    %c0_i32_8 = arith.constant 0 : i32
    %11 = arith.addi %1, %c0_i32_8 : i32
    %c0_9 = arith.constant 0 : index
    %12 = arith.index_cast %11 : i32 to index
    %c1 = arith.constant 1 : index
    %c0_10 = arith.constant 0 : index
    %13 = vector.load %arg2[%c0_9, %12, %c1, %c0_10] : memref<1x18x18x8xf32, #tpu.memory_space<vmem>>, vector<1x8x16x8xf32>
    %14 = vector.shape_cast %13 : vector<1x8x16x8xf32> to vector<8x16x8xf32>
    %15 = vector.shape_cast %14 : vector<8x16x8xf32> to vector<128x8xf32>
    %c0_11 = arith.constant 0 : index
    %c1_12 = arith.constant 1 : index
    %c0_13 = arith.constant 0 : index
    %c0_14 = arith.constant 0 : index
    %16 = vector.load %arg3[%c0_11, %c1_12, %c0_13, %c0_14] : memref<3x3x8x128xf32, #tpu.memory_space<vmem>>, vector<1x1x8x128xf32>
    %17 = vector.shape_cast %16 : vector<1x1x8x128xf32> to vector<8x128xf32>
    %cst_15 = arith.constant dense<0.000000e+00> : vector<128x128xf32>
    %18 = tpu.matmul %15, %17, %cst_15 {dimension_numbers = #tpu.dot_dimension_numbers<[1], [0], [0], [1], [0, 0, 1, 1], [], []>} : vector<128x8xf32>, vector<8x128xf32>, vector<128x128xf32> -> vector<128x128xf32>
    %c0_16 = arith.constant 0 : index
    %c0_17 = arith.constant 0 : index
    %19 = vector.load %arg7[%c0_16, %c0_17] : memref<128x128xf32, #tpu.memory_space<vmem>>, vector<128x128xf32>
    %20 = arith.addf %19, %18 : vector<128x128xf32>
    %c0_18 = arith.constant 0 : index
    %c0_19 = arith.constant 0 : index
    %21 = vector.load %arg7[%c0_18, %c0_19] : memref<128x128xf32, #tpu.memory_space<vmem>>, vector<128x128xf32>
    tpu.vector_store %arg7[%c0_18, %c0_19], %20 {strides = array<i32>} : memref<128x128xf32, #tpu.memory_space<vmem>>, vector<128x128xf32>,
    %c0_i32_20 = arith.constant 0 : i32
    %22 = arith.addi %1, %c0_i32_20 : i32
    %c0_21 = arith.constant 0 : index
    %23 = arith.index_cast %22 : i32 to index
    %c2 = arith.constant 2 : index
    %c0_22 = arith.constant 0 : index
    %24 = vector.load %arg2[%c0_21, %23, %c2, %c0_22] : memref<1x18x18x8xf32, #tpu.memory_space<vmem>>, vector<1x8x16x8xf32>
    %25 = vector.shape_cast %24 : vector<1x8x16x8xf32> to vector<8x16x8xf32>
    %26 = vector.shape_cast %25 : vector<8x16x8xf32> to vector<128x8xf32>
    %c0_23 = arith.constant 0 : index
    %c2_24 = arith.constant 2 : index
    %c0_25 = arith.constant 0 : index
    %c0_26 = arith.constant 0 : index
    %27 = vector.load %arg3[%c0_23, %c2_24, %c0_25, %c0_26] : memref<3x3x8x128xf32, #tpu.memory_space<vmem>>, vector<1x1x8x128xf32>
    %28 = vector.shape_cast %27 : vector<1x1x8x128xf32> to vector<8x128xf32>
    %cst_27 = arith.constant dense<0.000000e+00> : vector<128x128xf32>
    %29 = tpu.matmul %26, %28, %cst_27 {dimension_numbers = #tpu.dot_dimension_numbers<[1], [0], [0], [1], [0, 0, 1, 1], [], []>} : vector<128x8xf32>, vector<8x128xf32>, vector<128x128xf32> -> vector<128x128xf32>
    %c0_28 = arith.constant 0 : index
    %c0_29 = arith.constant 0 : index
    %30 = vector.load %arg7[%c0_28, %c0_29] : memref<128x128xf32, #tpu.memory_space<vmem>>, vector<128x128xf32>
    %31 = arith.addf %30, %29 : vector<128x128xf32>
    %c0_30 = arith.constant 0 : index
    %c0_31 = arith.constant 0 : index
    %32 = vector.load %arg7[%c0_30, %c0_31] : memref<128x128xf32, #tpu.memory_space<vmem>>, vector<128x128xf32>
    tpu.vector_store %arg7[%c0_30, %c0_31], %31 {strides = array<i32>} : memref<128x128xf32, #tpu.memory_space<vmem>>, vector<128x128xf32>,
    %c1_i32 = arith.constant 1 : i32
    %33 = arith.addi %1, %c1_i32 : i32
    %c0_32 = arith.constant 0 : index
    %34 = arith.index_cast %33 : i32 to index
    %c0_33 = arith.constant 0 : index
    %c0_34 = arith.constant 0 : index
    %35 = vector.load %arg2[%c0_32, %34, %c0_33, %c0_34] : memref<1x18x18x8xf32, #tpu.memory_space<vmem>>, vector<1x8x16x8xf32>
    %36 = vector.shape_cast %35 : vector<1x8x16x8xf32> to vector<8x16x8xf32>
    %37 = vector.shape_cast %36 : vector<8x16x8xf32> to vector<128x8xf32>
    %c1_35 = arith.constant 1 : index
    %c0_36 = arith.constant 0 : index
    %c0_37 = arith.constant 0 : index
    %c0_38 = arith.constant 0 : index
    %38 = vector.load %arg3[%c1_35, %c0_36, %c0_37, %c0_38] : memref<3x3x8x128xf32, #tpu.memory_space<vmem>>, vector<1x1x8x128xf32>
    %39 = vector.shape_cast %38 : vector<1x1x8x128xf32> to vector<8x128xf32>
    %cst_39 = arith.constant dense<0.000000e+00> : vector<128x128xf32>
    %40 = tpu.matmul %37, %39, %cst_39 {dimension_numbers = #tpu.dot_dimension_numbers<[1], [0], [0], [1], [0, 0, 1, 1], [], []>} : vector<128x8xf32>, vector<8x128xf32>, vector<128x128xf32> -> vector<128x128xf32>
    %c0_40 = arith.constant 0 : index
    %c0_41 = arith.constant 0 : index
    %41 = vector.load %arg7[%c0_40, %c0_41] : memref<128x128xf32, #tpu.memory_space<vmem>>, vector<128x128xf32>
    %42 = arith.addf %41, %40 : vector<128x128xf32>
    %c0_42 = arith.constant 0 : index
    %c0_43 = arith.constant 0 : index
    %43 = vector.load %arg7[%c0_42, %c0_43] : memref<128x128xf32, #tpu.memory_space<vmem>>, vector<128x128xf32>
    tpu.vector_store %arg7[%c0_42, %c0_43], %42 {strides = array<i32>} : memref<128x128xf32, #tpu.memory_space<vmem>>, vector<128x128xf32>,
    %c1_i32_44 = arith.constant 1 : i32
    %44 = arith.addi %1, %c1_i32_44 : i32
    %c0_45 = arith.constant 0 : index
    %45 = arith.index_cast %44 : i32 to index
    %c1_46 = arith.constant 1 : index
    %c0_47 = arith.constant 0 : index
    %46 = vector.load %arg2[%c0_45, %45, %c1_46, %c0_47] : memref<1x18x18x8xf32, #tpu.memory_space<vmem>>, vector<1x8x16x8xf32>
    %47 = vector.shape_cast %46 : vector<1x8x16x8xf32> to vector<8x16x8xf32>
    %48 = vector.shape_cast %47 : vector<8x16x8xf32> to vector<128x8xf32>
    %c1_48 = arith.constant 1 : index
    %c1_49 = arith.constant 1 : index
    %c0_50 = arith.constant 0 : index
    %c0_51 = arith.constant 0 : index
    %49 = vector.load %arg3[%c1_48, %c1_49, %c0_50, %c0_51] : memref<3x3x8x128xf32, #tpu.memory_space<vmem>>, vector<1x1x8x128xf32>
    %50 = vector.shape_cast %49 : vector<1x1x8x128xf32> to vector<8x128xf32>
    %cst_52 = arith.constant dense<0.000000e+00> : vector<128x128xf32>
    %51 = tpu.matmul %48, %50, %cst_52 {dimension_numbers = #tpu.dot_dimension_numbers<[1], [0], [0], [1], [0, 0, 1, 1], [], []>} : vector<128x8xf32>, vector<8x128xf32>, vector<128x128xf32> -> vector<128x128xf32>
    %c0_53 = arith.constant 0 : index
    %c0_54 = arith.constant 0 : index
    %52 = vector.load %arg7[%c0_53, %c0_54] : memref<128x128xf32, #tpu.memory_space<vmem>>, vector<128x128xf32>
    %53 = arith.addf %52, %51 : vector<128x128xf32>
    %c0_55 = arith.constant 0 : index
    %c0_56 = arith.constant 0 : index
    %54 = vector.load %arg7[%c0_55, %c0_56] : memref<128x128xf32, #tpu.memory_space<vmem>>, vector<128x128xf32>
    tpu.vector_store %arg7[%c0_55, %c0_56], %53 {strides = array<i32>} : memref<128x128xf32, #tpu.memory_space<vmem>>, vector<128x128xf32>,
    %c1_i32_57 = arith.constant 1 : i32
    %55 = arith.addi %1, %c1_i32_57 : i32
    %c0_58 = arith.constant 0 : index
    %56 = arith.index_cast %55 : i32 to index
    %c2_59 = arith.constant 2 : index
    %c0_60 = arith.constant 0 : index
    %57 = vector.load %arg2[%c0_58, %56, %c2_59, %c0_60] : memref<1x18x18x8xf32, #tpu.memory_space<vmem>>, vector<1x8x16x8xf32>
    %58 = vector.shape_cast %57 : vector<1x8x16x8xf32> to vector<8x16x8xf32>
    %59 = vector.shape_cast %58 : vector<8x16x8xf32> to vector<128x8xf32>
    %c1_61 = arith.constant 1 : index
    %c2_62 = arith.constant 2 : index
    %c0_63 = arith.constant 0 : index
    %c0_64 = arith.constant 0 : index
    %60 = vector.load %arg3[%c1_61, %c2_62, %c0_63, %c0_64] : memref<3x3x8x128xf32, #tpu.memory_space<vmem>>, vector<1x1x8x128xf32>
    %61 = vector.shape_cast %60 : vector<1x1x8x128xf32> to vector<8x128xf32>
    %cst_65 = arith.constant dense<0.000000e+00> : vector<128x128xf32>
    %62 = tpu.matmul %59, %61, %cst_65 {dimension_numbers = #tpu.dot_dimension_numbers<[1], [0], [0], [1], [0, 0, 1, 1], [], []>} : vector<128x8xf32>, vector<8x128xf32>, vector<128x128xf32> -> vector<128x128xf32>
    %c0_66 = arith.constant 0 : index
    %c0_67 = arith.constant 0 : index
    %63 = vector.load %arg7[%c0_66, %c0_67] : memref<128x128xf32, #tpu.memory_space<vmem>>, vector<128x128xf32>
    %64 = arith.addf %63, %62 : vector<128x128xf32>
    %c0_68 = arith.constant 0 : index
    %c0_69 = arith.constant 0 : index
    %65 = vector.load %arg7[%c0_68, %c0_69] : memref<128x128xf32, #tpu.memory_space<vmem>>, vector<128x128xf32>
    tpu.vector_store %arg7[%c0_68, %c0_69], %64 {strides = array<i32>} : memref<128x128xf32, #tpu.memory_space<vmem>>, vector<128x128xf32>,
    %c2_i32 = arith.constant 2 : i32
    %66 = arith.addi %1, %c2_i32 : i32
    %c0_70 = arith.constant 0 : index
    %67 = arith.index_cast %66 : i32 to index
    %c0_71 = arith.constant 0 : index
    %c0_72 = arith.constant 0 : index
    %68 = vector.load %arg2[%c0_70, %67, %c0_71, %c0_72] : memref<1x18x18x8xf32, #tpu.memory_space<vmem>>, vector<1x8x16x8xf32>
    %69 = vector.shape_cast %68 : vector<1x8x16x8xf32> to vector<8x16x8xf32>
    %70 = vector.shape_cast %69 : vector<8x16x8xf32> to vector<128x8xf32>
    %c2_73 = arith.constant 2 : index
    %c0_74 = arith.constant 0 : index
    %c0_75 = arith.constant 0 : index
    %c0_76 = arith.constant 0 : index
    %71 = vector.load %arg3[%c2_73, %c0_74, %c0_75, %c0_76] : memref<3x3x8x128xf32, #tpu.memory_space<vmem>>, vector<1x1x8x128xf32>
    %72 = vector.shape_cast %71 : vector<1x1x8x128xf32> to vector<8x128xf32>
    %cst_77 = arith.constant dense<0.000000e+00> : vector<128x128xf32>
    %73 = tpu.matmul %70, %72, %cst_77 {dimension_numbers = #tpu.dot_dimension_numbers<[1], [0], [0], [1], [0, 0, 1, 1], [], []>} : vector<128x8xf32>, vector<8x128xf32>, vector<128x128xf32> -> vector<128x128xf32>
    %c0_78 = arith.constant 0 : index
    %c0_79 = arith.constant 0 : index
    %74 = vector.load %arg7[%c0_78, %c0_79] : memref<128x128xf32, #tpu.memory_space<vmem>>, vector<128x128xf32>
    %75 = arith.addf %74, %73 : vector<128x128xf32>
    %c0_80 = arith.constant 0 : index
    %c0_81 = arith.constant 0 : index
    %76 = vector.load %arg7[%c0_80, %c0_81] : memref<128x128xf32, #tpu.memory_space<vmem>>, vector<128x128xf32>
    tpu.vector_store %arg7[%c0_80, %c0_81], %75 {strides = array<i32>} : memref<128x128xf32, #tpu.memory_space<vmem>>, vector<128x128xf32>,
    %c2_i32_82 = arith.constant 2 : i32
    %77 = arith.addi %1, %c2_i32_82 : i32
    %c0_83 = arith.constant 0 : index
    %78 = arith.index_cast %77 : i32 to index
    %c1_84 = arith.constant 1 : index
    %c0_85 = arith.constant 0 : index
    %79 = vector.load %arg2[%c0_83, %78, %c1_84, %c0_85] : memref<1x18x18x8xf32, #tpu.memory_space<vmem>>, vector<1x8x16x8xf32>
    %80 = vector.shape_cast %79 : vector<1x8x16x8xf32> to vector<8x16x8xf32>
    %81 = vector.shape_cast %80 : vector<8x16x8xf32> to vector<128x8xf32>
    %c2_86 = arith.constant 2 : index
    %c1_87 = arith.constant 1 : index
    %c0_88 = arith.constant 0 : index
    %c0_89 = arith.constant 0 : index
    %82 = vector.load %arg3[%c2_86, %c1_87, %c0_88, %c0_89] : memref<3x3x8x128xf32, #tpu.memory_space<vmem>>, vector<1x1x8x128xf32>
    %83 = vector.shape_cast %82 : vector<1x1x8x128xf32> to vector<8x128xf32>
    %cst_90 = arith.constant dense<0.000000e+00> : vector<128x128xf32>
    %84 = tpu.matmul %81, %83, %cst_90 {dimension_numbers = #tpu.dot_dimension_numbers<[1], [0], [0], [1], [0, 0, 1, 1], [], []>} : vector<128x8xf32>, vector<8x128xf32>, vector<128x128xf32> -> vector<128x128xf32>
    %c0_91 = arith.constant 0 : index
    %c0_92 = arith.constant 0 : index
    %85 = vector.load %arg7[%c0_91, %c0_92] : memref<128x128xf32, #tpu.memory_space<vmem>>, vector<128x128xf32>
    %86 = arith.addf %85, %84 : vector<128x128xf32>
    %c0_93 = arith.constant 0 : index
    %c0_94 = arith.constant 0 : index
    %87 = vector.load %arg7[%c0_93, %c0_94] : memref<128x128xf32, #tpu.memory_space<vmem>>, vector<128x128xf32>
    tpu.vector_store %arg7[%c0_93, %c0_94], %86 {strides = array<i32>} : memref<128x128xf32, #tpu.memory_space<vmem>>, vector<128x128xf32>,
    %c2_i32_95 = arith.constant 2 : i32
    %88 = arith.addi %1, %c2_i32_95 : i32
    %c0_96 = arith.constant 0 : index
    %89 = arith.index_cast %88 : i32 to index
    %c2_97 = arith.constant 2 : index
    %c0_98 = arith.constant 0 : index
    %90 = vector.load %arg2[%c0_96, %89, %c2_97, %c0_98] : memref<1x18x18x8xf32, #tpu.memory_space<vmem>>, vector<1x8x16x8xf32>
    %91 = vector.shape_cast %90 : vector<1x8x16x8xf32> to vector<8x16x8xf32>
    %92 = vector.shape_cast %91 : vector<8x16x8xf32> to vector<128x8xf32>
    %c2_99 = arith.constant 2 : index
    %c2_100 = arith.constant 2 : index
    %c0_101 = arith.constant 0 : index
    %c0_102 = arith.constant 0 : index
    %93 = vector.load %arg3[%c2_99, %c2_100, %c0_101, %c0_102] : memref<3x3x8x128xf32, #tpu.memory_space<vmem>>, vector<1x1x8x128xf32>
    %94 = vector.shape_cast %93 : vector<1x1x8x128xf32> to vector<8x128xf32>
    %cst_103 = arith.constant dense<0.000000e+00> : vector<128x128xf32>
    %95 = tpu.matmul %92, %94, %cst_103 {dimension_numbers = #tpu.dot_dimension_numbers<[1], [0], [0], [1], [0, 0, 1, 1], [], []>} : vector<128x8xf32>, vector<8x128xf32>, vector<128x128xf32> -> vector<128x128xf32>
    %c0_104 = arith.constant 0 : index
    %c0_105 = arith.constant 0 : index
    %96 = vector.load %arg7[%c0_104, %c0_105] : memref<128x128xf32, #tpu.memory_space<vmem>>, vector<128x128xf32>
    %97 = arith.addf %96, %95 : vector<128x128xf32>
    %c0_106 = arith.constant 0 : index
    %c0_107 = arith.constant 0 : index
    %98 = vector.load %arg7[%c0_106, %c0_107] : memref<128x128xf32, #tpu.memory_space<vmem>>, vector<128x128xf32>
    tpu.vector_store %arg7[%c0_106, %c0_107], %97 {strides = array<i32>} : memref<128x128xf32, #tpu.memory_space<vmem>>, vector<128x128xf32>,
    %c0_108 = arith.constant 0 : index
    %c0_109 = arith.constant 0 : index
    %99 = vector.load %arg7[%c0_108, %c0_109] : memref<128x128xf32, #tpu.memory_space<vmem>>, vector<128x128xf32>
    %c0_110 = arith.constant 0 : index
    %c0_111 = arith.constant 0 : index
    %100 = vector.load %arg4[%c0_110, %c0_111] : memref<1x128xf32, #tpu.memory_space<vmem>>, vector<1x128xf32>
    %101 = vector.broadcast %100 : vector<1x128xf32> to vector<128x128xf32>
    %102 = arith.mulf %99, %101 : vector<128x128xf32>
    %c0_112 = arith.constant 0 : index
    %c0_113 = arith.constant 0 : index
    %103 = vector.load %arg5[%c0_112, %c0_113] : memref<1x128xf32, #tpu.memory_space<vmem>>, vector<1x128xf32>
    %104 = vector.broadcast %103 : vector<1x128xf32> to vector<128x128xf32>
    %105 = arith.addf %102, %104 : vector<128x128xf32>
    %cst_114 = arith.constant 2.000000e+01 : f32
    %106 = vector.broadcast %cst_114 : f32 to vector<128x128xf32>
    %107 = arith.minimumf %105, %106 : vector<128x128xf32>
    %108 = math.exp %107 : vector<128x128xf32>
    %cst_115 = arith.constant 1.000000e+00 : f32
    %109 = vector.broadcast %cst_115 : f32 to vector<128x128xf32>
    %110 = arith.addf %109, %108 : vector<128x128xf32>
    %cst_116 = arith.constant 1.000000e+00 : f32
    %111 = vector.broadcast %cst_116 : f32 to vector<128x128xf32>
    %112 = arith.addf %111, %108 : vector<128x128xf32>
    %113 = arith.mulf %110, %112 : vector<128x128xf32>
    %cst_117 = arith.constant 1.000000e+00 : f32
    %114 = vector.broadcast %cst_117 : f32 to vector<128x128xf32>
    %115 = arith.addf %113, %114 : vector<128x128xf32>
    %116 = tpu.reciprocal %115 {approx = true} : vector<128x128xf32> -> vector<128x128xf32>
    %117 = arith.mulf %115, %116 : vector<128x128xf32>
    %cst_118 = arith.constant 2.000000e+00 : f32
    %118 = vector.broadcast %cst_118 : f32 to vector<128x128xf32>
    %119 = arith.subf %118, %117 : vector<128x128xf32>
    %120 = arith.mulf %116, %119 : vector<128x128xf32>
    %cst_119 = arith.constant 1.000000e+00 : f32
    %121 = vector.broadcast %cst_119 : f32 to vector<128x128xf32>
    %122 = arith.subf %113, %121 : vector<128x128xf32>
    %123 = arith.mulf %122, %120 : vector<128x128xf32>
    %124 = arith.mulf %105, %123 : vector<128x128xf32>
    %125 = vector.shape_cast %124 : vector<128x128xf32> to vector<8x16x128xf32>
    %c0_120 = arith.constant 0 : index
    %c0_121 = arith.constant 0 : index
    %c0_122 = arith.constant 0 : index
    %c0_123 = arith.constant 0 : index
    %126 = vector.load %arg6[%c0_120, %c0_121, %c0_122, %c0_123] : memref<1x8x16x128xf32, #tpu.memory_space<vmem>>, vector<1x8x16x128xf32>
    %127 = vector.shape_cast %126 : vector<1x8x16x128xf32> to vector<8x16x128xf32>
    %128 = vector.shape_cast %125 : vector<8x16x128xf32> to vector<1x8x16x128xf32>
    tpu.vector_store %arg6[%c0_120, %c0_121, %c0_122, %c0_123], %128 {strides = array<i32>} : memref<1x8x16x128xf32, #tpu.memory_space<vmem>>, vector<1x8x16x128xf32>,
    return
  }
  func.func @transform_0(%arg0: i32, %arg1: i32) -> (i32, i32, i32, i32) {
    %c0_i32 = arith.constant 0 : i32
    %c0_i32_0 = arith.constant 0 : i32
    %c0_i32_1 = arith.constant 0 : i32
    %c0_i32_2 = arith.constant 0 : i32
    return %arg0, %c0_i32, %c0_i32_0, %c0_i32_1 : i32, i32, i32, i32
  }
  func.func @transform_1(%arg0: i32, %arg1: i32) -> (i32, i32, i32, i32) {
    %c0_i32 = arith.constant 0 : i32
    %c0_i32_0 = arith.constant 0 : i32
    %c0_i32_1 = arith.constant 0 : i32
    %c0_i32_2 = arith.constant 0 : i32
    %c0_i32_3 = arith.constant 0 : i32
    return %c0_i32, %c0_i32_0, %c0_i32_1, %c0_i32_2 : i32, i32, i32, i32
  }
  func.func @transform_2(%arg0: i32, %arg1: i32) -> (i32, i32) {
    %c0_i32 = arith.constant 0 : i32
    %c0_i32_0 = arith.constant 0 : i32
    %c0_i32_1 = arith.constant 0 : i32
    return %c0_i32, %c0_i32_0 : i32, i32
  }
  func.func @transform_3(%arg0: i32, %arg1: i32) -> (i32, i32) {
    %c0_i32 = arith.constant 0 : i32
    %c0_i32_0 = arith.constant 0 : i32
    %c0_i32_1 = arith.constant 0 : i32
    return %c0_i32, %c0_i32_0 : i32, i32
  }
  func.func @transform_4(%arg0: i32, %arg1: i32) -> (i32, i32, i32, i32) {
    %c0_i32 = arith.constant 0 : i32
    %c0_i32_0 = arith.constant 0 : i32
    %c0_i32_1 = arith.constant 0 : i32
    return %arg0, %arg1, %c0_i32, %c0_i32_0 : i32, i32, i32, i32
  }
}

</mosaic_0001>

<bundles_post_ra>
// kernel: tpu_custom_call.1
= control target key start
LH: loop header
LB: loop body
LE: loop exit
PB: predicated region body
PF: predicated region fallthrough
CT: control target
= control target key end

     0   :  { %9 = vsyncpa [#allocation4], 0  ;;  %s4870_s0 = inlined_call_operand.vmem [shape: f32[2,18,18,8], index: 0, kind: input, shape index: {}]   ;;  %s4871_s1 = inlined_call_operand.vmem [shape: f32[3,3,8,128], index: 1, kind: input, shape index: {}]   ;;  %s4872_s2 = inlined_call_operand.vmem [shape: f32[1,128], index: 2, kind: input, shape index: {}]   ;;  %s4873_s3 = inlined_call_operand.vmem [shape: f32[1,128], index: 3, kind: input, shape index: {}]   ;;  %s4874_s4 = inlined_call_operand.hbm [shape: f32[2,16,16,128], index: 4, kind: output, shape index: {}]  }
   0x1   :  { %11 = vsyncpa [#allocation4 + $0x1], 0  ;;  %s3844_s15 = smov 0   ;;  %s3846_s16 = smov 0  }
   0x2   :  { %s3848_s17 = smov 0   ;;  %s3850_s18 = smov 0  }
   0x3   :  { %s3852_s19 = smov 0   ;;  %s3854_s20 = smov 0  }
   0x4   :  { %s3856_s21 = smov 0   ;;  %s3858_s22 = smov 0  }
   0x5 LB: > { %s2908_s23 = sadd.s32 4294967295, %s3814_s22   ;;  %s2909_s24 = sadd.s32 4294967294, %s3814_s22   ;;  %s3814_s22 = sphi %s3858_s22, %s17_s22   ;;  %s3810_s21 = sphi %s3856_s21, %s4911_s21   ;;  %s3806_s20 = sphi %s3854_s20, %s4910_s20   ;;  %s3802_s19 = sphi %s3852_s19, %s4909_s19   ;;  %s3798_s18 = sphi %s3850_s18, %s4908_s18   ;;  %s3794_s17 = sphi %s3848_s17, %s4907_s17   ;;  %s3790_s16 = sphi %s3846_s16, %s4906_s16   ;;  %s3786_s15 = sphi %s3844_s15, %s4905_s15  }
   0x6   : > { %s26_s25 = sadd.s32 1, %s3806_s20  ;;  %s29_s26 = sadd.s32 1, %s3810_s21 }
   0x7   : > { %p27_p0 = scmp.ge.s32.totalorder %s26_s25, 2  ;;  %p137_p1 = scmp.ne.s32.totalorder %s3794_s17, %s3790_s16 }
   0x8   : > { %p138_p2 = scmp.eq.s32.totalorder %s2908_s23, 3  ;;  %p143_p5 = scmp.ne.s32.totalorder %s3790_s16, %s3786_s15 }
   0x9   : > { %s4913_s25 = smov (%p27_p0, %s26_s25), 0  ;;  %s4915_s26 = smov (!%p27_p0, %s29_s26), %s3810_s21 }
   0xa   : > { %s123_s27 = ssub.s32 %s3806_s20, %s4913_s25  ;;  %p3895_p3 = por %p138_p2, %p137_p1 }
   0xb   : > { %p31_p4 = scmp.ge.s32.totalorder %s4915_s26, 2  ;;  %p144_p6 = scmp.eq.s32.totalorder %s2909_s24, 3 }
   0xc   : > { %p2912_p7 = scmp.ge.s32.totalorder %s3814_s22, 1  ;;  %p179_p9 = scmp.lt.s32.totalorder %s3814_s22, 5 }
   0xd   : > { %s4917_s26 = smov (%p31_p4, %s4915_s26), 0  ;;  %p3904_p8 = por %p144_p6, %p143_p5 }
   0xe   : > { %s122_s30 = ssub.s32 %s3810_s21, %s4917_s26  ;;  %s127_s5 = sadd.s32 1, %s3794_s17 }
   0xf   : > { %s124_s6 = sor.u32 %s123_s27, %s122_s30  ;;  %p180_p10 = pnand %p2912_p7, %p179_p9 }
  0x10   : > { %p125_p11 = scmp.eq.s32.totalorder %s124_s6, 0 }
  0x11   : > { %183 = sbr.rel (%p180_p10) target bundleno = 453 (0x1c5), region = 36 }
  0x12   : > { %s3913_s7 = scalar_select %p125_p11, %s3794_s17, %s127_s5  }
  0x16   : > { %v230_v0 = vld [vmem:[%s4871_s1] sm:$0xff]  ;;  %p205_p12 = scmp.lt.s32.totalorder %s3802_s19, 1  ;;  %v2933_v1 = vld [vmem:[%s4871_s1 + $0x8] sm:$0xff]  ;;  %v2950_v2 = vld [vmem:[%s4871_s1 + $0x10] sm:$0xff]  ;;  %s2916_s23 = smul.u32 192, %s3798_s18  ;;  %vm231_vm0 = vcmask 64512  }
  0x17   : > { %3582 = vmatprep.subr.mxu1 %v230_v0  ;;  %3348 = vmatprep.subr.mxu0 %v230_v0  ;;  %v2985_v9 = vld [vmem:[%s4871_s1 + $0x18] sm:$0xff]  ;;  %v3018_v10 = vld [vmem:[%s4871_s1 + $0x20] sm:$0xff]  ;;  %v4029_v27 = vld [vmem:[%s4871_s1 + $0x28] sm:$0xff]  ;;  %s202_s11 = sand.u32 1, %s3790_s16   ;;  %s3816_s9 = smov [#allocation3]  }
  0x18   : > { %3583 = vmatpush3.msra.mxu1 %v230_v0  ;;  %3349 = vmatpush3.msra.mxu0 %v230_v0  ;;  %s206_s14 = scalar_select %p205_p12, %s3802_s19, 1  ;;  %v4034_v28 = vld [vmem:[%s4871_s1 + $0x30] sm:$0xff]  ;;  %v3119_v55 = vld [vmem:[%s4871_s1 + $0x38] sm:$0xff]  ;;  %v3152_v56 = vld [vmem:[%s4871_s1 + $0x40] sm:$0xff] }
  0x19   : > { %3374 = vmatprep.subr.mxu1 %v2933_v1  ;;  %3400 = vmatprep.subr.mxu0 %v2950_v2  ;;  %s2913_s12 = sshll.u32 %s202_s11, 7  ;;  %s3726_s10 = sshll.u32 %s3816_s9, 4  ;;  %s3727_s10 = int_to_ptr.vmem [resolvable:$false] %s3726_s10 }
  0x1a   : > { %s3584_s24 = smul.u32 432, %s206_s14  ;;  %s4743_s13 = scalar_lea.vmem [#allocation3], %s2913_s12 }
  0x1b   : > { %s3194_s14 = sshll.u32 %s3798_s18, 4  ;;  %s2822_s30 = sshll.u32 %s4743_s13, 4  ;;  %s4812_s30 = int_to_ptr.vmem [resolvable:$true] %s2822_s30 }
  0x1c   : > { %s209_s5 = scalar_lea.vmem %s4870_s0, %s3584_s24  ;;  %s3722_s8 = scalar_lea.vmem %s4812_s30, 2048 }
  0x1d   : > { %s3930_s6 = scalar_lea.vmem %s209_s5, %s2916_s23  ;;  %s3190_s23 = sshll.u32 %s3802_s19, 5 }
  0x1e   : > { %v214_v3 = vld [vmem:[%s3930_s6] sm:$0xff]  ;;  %v215_v5 = vld [vmem:[%s3930_s6 + $0x8] sm:$0xff]  ;;  %v3944_v7 = vld [vmem:[%s3930_s6 + $0x18] sm:$0xff]  ;;  %s2819_s24 = sadd.s32 %s3194_s14, %s3190_s23  ;;  %p3723_p13 = scmp.ne.s32.totalorder %s4812_s30, %s3722_s8 }
  0x1f   : > { %v3934_v4 = vld [vmem:[%s3930_s6 + $0x60] sm:$0xff]  ;;  %3350 = vmatprep.mubr.msk.f32.mxu0 %vm231_vm0, %v214_v3  ;;  %v3941_v6 = vld [vmem:[%s3930_s6 + $0x68] sm:$0xff]  ;;  %v3947_v8 = vld [vmem:[%s3930_s6 + $0x78] sm:$0xff]  ;;  %s3191_s27 = sshll.u32 %s2819_s24, 7  ;;  %s3728_s12 = scalar_lea.vmem %s3727_s10, 4096 }
  0x20   : > { %3362 = vmatprep.mubr.msk.f32.mxu1 %vm231_vm0, %v3934_v4  ;;  %3351 = vmatmul.mubr.msk.f32.vlgmr.msra.gmra.mxu0 %vm231_vm0, %v215_v5  ;;  %v3959_v11 = vld [vmem:[%s3930_s6 + $0x20] sm:$0xff]  ;;  %v3969_v13 = vld [vmem:[%s3930_s6 + $0x30] sm:$0xff]  ;;  %v3983_v15 = vld [vmem:[%s3930_s6 + $0x38] sm:$0xff]  ;;  %s4810_s5 = scalar_lea.hbm %s4874_s4, %s3191_s27  ;;  %p3724_p0 = pnand %p3723_p13, %p3895_p3 }
  0x21   : > { %3363 = vmatmul.mubr.msk.f32.vlgmr.msra.gmra.mxu1 %vm231_vm0, %v3941_v6  ;;  %3401 = vmatpush3.msra.mxu0 %v2950_v2  ;;  %v3962_v12 = vld [vmem:[%s3930_s6 + $0x80] sm:$0xff]  ;;  %v3972_v14 = vld [vmem:[%s3930_s6 + $0x90] sm:$0xff]  ;;  %v3986_v16 = vld [vmem:[%s3930_s6 + $0x98] sm:$0xff]  ;;  %p3729_p2 = scmp.lt.s32.totalorder %s4812_s30, %s3727_s10  ;;  %p3730_p4 = scmp.lt.s32.totalorder %s3728_s12, %s3722_s8 }
  0x22   : > { %3375 = vmatpush3.msra.mxu1 %v2933_v1  ;;  %3353 = vmatprep.mubr.msk.f32.mxu0 %vm231_vm0, %v3944_v7  ;;  %v3989_v17 = vld [vmem:[%s3930_s6 + $0x48] sm:$0xff]  ;;  %v4003_v19 = vld [vmem:[%s3930_s6 + $0x50] sm:$0xff]  ;;  %v4019_v25 = vld [vmem:[%s3930_s6 + $0x19] sm:$0xff]  ;;  %p3725_p1 = pneg %p3724_p0 }
  0x23   : > { %3365 = vmatprep.mubr.msk.f32.mxu1 %vm231_vm0, %v3947_v8  ;;  %3426 = vmatprep.subr.mxu1 %v2985_v9  ;;  %v3992_v18 = vld [vmem:[%s3930_s6 + $0xa8] sm:$0xff]  ;;  %v4006_v20 = vld [vmem:[%s3930_s6 + $0xb0] sm:$0xff]  ;;  %v4022_v26 = vld [vmem:[%s3930_s6 + $0x1a] sm:$0xff]  ;;  %p3731_p5 = por %p3730_p4, %p3729_p2 }
  0x24   : > { %3452 = vmatprep.subr.mxu0 %v3018_v10  ;;  %3354 = vmatmul.mubr.msk.f32.gmra.mxu0 %vm231_vm0, %v3959_v11  ;;  %v441_v21 = vld [vmem:[%s3930_s6 + $0x1] sm:$0xff]  ;;  %v442_v23 = vld [vmem:[%s3930_s6 + $0x9] sm:$0xff]  ;;  %v4045_v31 = vld [vmem:[%s3930_s6 + $0x31] sm:$0xff] }
  0x25   : > { %3366 = vmatmul.mubr.msk.f32.gmra.mxu1 %vm231_vm0, %v3962_v12  ;;  %3356 = vmatprep.mubr.msk.f32.mxu0 %vm231_vm0, %v3969_v13  ;;  %v700_v22 = vld [vmem:[%s3930_s6 + $0x2] sm:$0xff]  ;;  %v701_v24 = vld [vmem:[%s3930_s6 + $0xa] sm:$0xff]  ;;  %v4048_v32 = vld [vmem:[%s3930_s6 + $0x32] sm:$0xff]  ;;  %p3732_p6 = pnand %p3731_p5, %p3725_p1 }
  0x26   : > { %3368 = vmatprep.mubr.msk.f32.mxu1 %vm231_vm0, %v3972_v14  ;;  %v444_v29 = vld [vmem:[%s3930_s6 + $0x21] sm:$0xff]  ;;  %v4060_v33 = vld [vmem:[%s3930_s6 + $0x39] sm:$0xff]  ;;  %v4066_v35 = vld [vmem:[%s3930_s6 + $0x49] sm:$0xff] }
  0x27   : > { %v4038_v30 = vld [vmem:[%s3930_s6 + $0x22] sm:$0xff]  ;;  %v4063_v34 = vld [vmem:[%s3930_s6 + $0x3a] sm:$0xff]  ;;  %v4069_v36 = vld [vmem:[%s3930_s6 + $0x4a] sm:$0xff] }
  0x28   : > { %3357 = vmatmul.mubr.msk.f32.gmra.mxu0 %vm231_vm0, %v3983_v15  ;;  %v4080_v37 = vld [vmem:[%s3930_s6 + $0x51] sm:$0xff]  ;;  %v4086_v39 = vld [vmem:[%s3930_s6 + $0x61] sm:$0xff]  ;;  %v4100_v41 = vld [vmem:[%s3930_s6 + $0x69] sm:$0xff] }
  0x29   : > { %3369 = vmatmul.mubr.msk.f32.gmra.mxu1 %vm231_vm0, %v3986_v16  ;;  %3359 = vmatprep.mubr.msk.f32.mxu0 %vm231_vm0, %v3989_v17  ;;  %v4083_v38 = vld [vmem:[%s3930_s6 + $0x52] sm:$0xff]  ;;  %v4089_v40 = vld [vmem:[%s3930_s6 + $0x62] sm:$0xff]  ;;  %v4103_v42 = vld [vmem:[%s3930_s6 + $0x6a] sm:$0xff] }
  0x2a   : > { %3371 = vmatprep.mubr.msk.f32.mxu1 %vm231_vm0, %v3992_v18  ;;  %v4106_v43 = vld [vmem:[%s3930_s6 + $0x79] sm:$0xff]  ;;  %v4120_v45 = vld [vmem:[%s3930_s6 + $0x81] sm:$0xff]  ;;  %v4126_v47 = vld [vmem:[%s3930_s6 + $0x91] sm:$0xff] }
  0x2b   : > { %v4109_v44 = vld [vmem:[%s3930_s6 + $0x7a] sm:$0xff]  ;;  %v4123_v46 = vld [vmem:[%s3930_s6 + $0x82] sm:$0xff]  ;;  %v4129_v48 = vld [vmem:[%s3930_s6 + $0x92] sm:$0xff] }
  0x2c   : > { %3360 = vmatmul.mubr.msk.f32.gmra.mxu0 %vm231_vm0, %v4003_v19  ;;  %v4140_v49 = vld [vmem:[%s3930_s6 + $0x99] sm:$0xff]  ;;  %v4146_v51 = vld [vmem:[%s3930_s6 + $0xa9] sm:$0xff]  ;;  %v4160_v53 = vld [vmem:[%s3930_s6 + $0xb1] sm:$0xff] }
  0x2d   : > { %3372 = vmatmul.mubr.msk.f32.gmra.mxu1 %vm231_vm0, %v4006_v20  ;;  %3402 = vmatprep.mubr.msk.f32.mxu0 %vm231_vm0, %v700_v22  ;;  %v4143_v50 = vld [vmem:[%s3930_s6 + $0x9a] sm:$0xff]  ;;  %v4149_v52 = vld [vmem:[%s3930_s6 + $0xaa] sm:$0xff]  ;;  %v4163_v54 = vld [vmem:[%s3930_s6 + $0xb2] sm:$0xff] }
  0x2e   : > { %3376 = vmatprep.mubr.msk.f32.mxu1 %vm231_vm0, %v441_v21  ;;  %v2983_v57 = vld [vmem:[%s3930_s6 + $0xc0] sm:$0xff]  ;;  %v2984_v59 = vld [vmem:[%s3930_s6 + $0xc8] sm:$0xff]  ;;  %v3084_v62 = vld [vmem:[%s3930_s6 + $0xd8] sm:$0xff] }
  0x2f   : > { %v4230_v58 = vld [vmem:[%s3930_s6 + $0xc1] sm:$0xff]  ;;  %v4241_v60 = vld [vmem:[%s3930_s6 + $0xc9] sm:$0xff]  ;;  %v3117_v1 = vld [vmem:[%s3930_s6 + $0xd9] sm:$0xff] }
  0x30   : > { %3403 = vmatmul.mubr.msk.f32.vlgmr.msra.gmra.mxu0 %vm231_vm0, %v701_v24  ;;  %v3049_v61 = vld [vmem:[%s3930_s6 + $0xc2] sm:$0xff]  ;;  %v3050_v63 = vld [vmem:[%s3930_s6 + $0xca] sm:$0xff]  ;;  %v3150_v2 = vld [vmem:[%s3930_s6 + $0xda] sm:$0xff] }
  0x31   : > { %3377 = vmatmul.mubr.msk.f32.vlgmr.msra.gmra.mxu1 %vm231_vm0, %v442_v23  ;;  %3453 = vmatpush3.msra.mxu0 %v3018_v10  ;;  %v3085_v0 = vld [vmem:[%s3930_s6 + $0xe0] sm:$0xff] }
  0x32   : > { %3427 = vmatpush3.msra.mxu1 %v2985_v9  ;;  %3379 = vmatprep.mubr.msk.f32.mxu1 %vm231_vm0, %v4019_v25  ;;  %v3118_v3 = vld [vmem:[%s3930_s6 + $0xe1] sm:$0xff] }
  0x33   : > { %3405 = vmatprep.mubr.msk.f32.mxu0 %vm231_vm0, %v4022_v26  ;;  %3478 = vmatprep.subr.mxu1 %v4029_v27 }
  0x34   : > { %3504 = vmatprep.subr.mxu0 %v4034_v28  ;;  %3406 = vmatmul.mubr.msk.f32.gmra.mxu0 %vm231_vm0, %v4038_v30 }
  0x35   : > { %3380 = vmatmul.mubr.msk.f32.gmra.mxu1 %vm231_vm0, %v444_v29  ;;  %3408 = vmatprep.mubr.msk.f32.mxu0 %vm231_vm0, %v4048_v32 }
  0x36   : > { %3382 = vmatprep.mubr.msk.f32.mxu1 %vm231_vm0, %v4045_v31 }
  0x38   : > { %3409 = vmatmul.mubr.msk.f32.gmra.mxu0 %vm231_vm0, %v4063_v34 }
  0x39   : > { %3383 = vmatmul.mubr.msk.f32.gmra.mxu1 %vm231_vm0, %v4060_v33  ;;  %3411 = vmatprep.mubr.msk.f32.mxu0 %vm231_vm0, %v4069_v36 }
  0x3a   : > { %3385 = vmatprep.mubr.msk.f32.mxu1 %vm231_vm0, %v4066_v35 }
  0x3c   : > { %3412 = vmatmul.mubr.msk.f32.gmra.mxu0 %vm231_vm0, %v4083_v38 }
  0x3d   : > { %3386 = vmatmul.mubr.msk.f32.gmra.mxu1 %vm231_vm0, %v4080_v37  ;;  %3414 = vmatprep.mubr.msk.f32.mxu0 %vm231_vm0, %v4089_v40 }
  0x3e   : > { %3388 = vmatprep.mubr.msk.f32.mxu1 %vm231_vm0, %v4086_v39 }
  0x40   : > { %3415 = vmatmul.mubr.msk.f32.gmra.mxu0 %vm231_vm0, %v4103_v42 }
  0x41   : > { %3389 = vmatmul.mubr.msk.f32.gmra.mxu1 %vm231_vm0, %v4100_v41  ;;  %3417 = vmatprep.mubr.msk.f32.mxu0 %vm231_vm0, %v4109_v44 }
  0x42   : > { %3391 = vmatprep.mubr.msk.f32.mxu1 %vm231_vm0, %v4106_v43 }
  0x44   : > { %3418 = vmatmul.mubr.msk.f32.gmra.mxu0 %vm231_vm0, %v4123_v46 }
  0x45   : > { %3392 = vmatmul.mubr.msk.f32.gmra.mxu1 %vm231_vm0, %v4120_v45  ;;  %3420 = vmatprep.mubr.msk.f32.mxu0 %vm231_vm0, %v4129_v48 }
  0x46   : > { %3394 = vmatprep.mubr.msk.f32.mxu1 %vm231_vm0, %v4126_v47 }
  0x48   : > { %3421 = vmatmul.mubr.msk.f32.gmra.mxu0 %vm231_vm0, %v4143_v50 }
  0x49   : > { %3395 = vmatmul.mubr.msk.f32.gmra.mxu1 %vm231_vm0, %v4140_v49  ;;  %3423 = vmatprep.mubr.msk.f32.mxu0 %vm231_vm0, %v4149_v52 }
  0x4a   : > { %3397 = vmatprep.mubr.msk.f32.mxu1 %vm231_vm0, %v4146_v51 }
  0x4c   : > { %3424 = vmatmul.mubr.msk.f32.gmra.mxu0 %vm231_vm0, %v4163_v54 }
  0x4d   : > { %3398 = vmatmul.mubr.msk.f32.gmra.mxu1 %vm231_vm0, %v4160_v53  ;;  %3454 = vmatprep.mubr.msk.f32.mxu0 %vm231_vm0, %v4019_v25 }
  0x4e   : > { %3428 = vmatprep.mubr.msk.f32.mxu1 %vm231_vm0, %v3944_v7 }
  0x50   : > { %3455 = vmatmul.mubr.msk.f32.vlgmr.msra.gmra.mxu0 %vm231_vm0, %v444_v29 }
  0x51   : > { %3429 = vmatmul.mubr.msk.f32.vlgmr.msra.gmra.mxu1 %vm231_vm0, %v3959_v11  ;;  %3505 = vmatpush3.msra.mxu0 %v4034_v28 }
  0x52   : > { %3479 = vmatpush3.msra.mxu1 %v4029_v27  ;;  %3431 = vmatprep.mubr.msk.f32.mxu1 %vm231_vm0, %v3969_v13 }
  0x53   : > { %3457 = vmatprep.mubr.msk.f32.mxu0 %vm231_vm0, %v4045_v31  ;;  %3530 = vmatprep.subr.mxu1 %v3119_v55 }
  0x54   : > { %3556 = vmatprep.subr.mxu0 %v3152_v56  ;;  %3458 = vmatmul.mubr.msk.f32.gmra.mxu0 %vm231_vm0, %v4060_v33 }
  0x55   : > { %3432 = vmatmul.mubr.msk.f32.gmra.mxu1 %vm231_vm0, %v3983_v15  ;;  %3460 = vmatprep.mubr.msk.f32.mxu0 %vm231_vm0, %v4066_v35 }
  0x56   : > { %3434 = vmatprep.mubr.msk.f32.mxu1 %vm231_vm0, %v3989_v17 }
  0x58   : > { %3461 = vmatmul.mubr.msk.f32.gmra.mxu0 %vm231_vm0, %v4080_v37 }
  0x59   : > { %3435 = vmatmul.mubr.msk.f32.gmra.mxu1 %vm231_vm0, %v4003_v19  ;;  %3463 = vmatprep.mubr.msk.f32.mxu0 %vm231_vm0, %v4086_v39 }
  0x5a   : > { %3437 = vmatprep.mubr.msk.f32.mxu1 %vm231_vm0, %v3934_v4 }
  0x5c   : > { %3464 = vmatmul.mubr.msk.f32.gmra.mxu0 %vm231_vm0, %v4100_v41 }
  0x5d   : > { %3438 = vmatmul.mubr.msk.f32.gmra.mxu1 %vm231_vm0, %v3941_v6  ;;  %3466 = vmatprep.mubr.msk.f32.mxu0 %vm231_vm0, %v4106_v43 }
  0x5e   : > { %3440 = vmatprep.mubr.msk.f32.mxu1 %vm231_vm0, %v3947_v8 }
  0x60   : > { %3467 = vmatmul.mubr.msk.f32.gmra.mxu0 %vm231_vm0, %v4120_v45 }
  0x61   : > { %3441 = vmatmul.mubr.msk.f32.gmra.mxu1 %vm231_vm0, %v3962_v12  ;;  %3469 = vmatprep.mubr.msk.f32.mxu0 %vm231_vm0, %v4126_v47 }
  0x62   : > { %3443 = vmatprep.mubr.msk.f32.mxu1 %vm231_vm0, %v3972_v14 }
  0x64   : > { %3470 = vmatmul.mubr.msk.f32.gmra.mxu0 %vm231_vm0, %v4140_v49 }
  0x65   : > { %3444 = vmatmul.mubr.msk.f32.gmra.mxu1 %vm231_vm0, %v3986_v16  ;;  %3472 = vmatprep.mubr.msk.f32.mxu0 %vm231_vm0, %v4146_v51 }
  0x66   : > { %3446 = vmatprep.mubr.msk.f32.mxu1 %vm231_vm0, %v3992_v18 }
  0x68   : > { %3473 = vmatmul.mubr.msk.f32.gmra.mxu0 %vm231_vm0, %v4160_v53 }
  0x69   : > { %3447 = vmatmul.mubr.msk.f32.gmra.mxu1 %vm231_vm0, %v4006_v20  ;;  %3475 = vmatprep.mubr.msk.f32.mxu0 %vm231_vm0, %v4230_v58 }
  0x6a   : > { %3449 = vmatprep.mubr.msk.f32.mxu1 %vm231_vm0, %v2983_v57 }
  0x6c   : > { %3476 = vmatmul.mubr.msk.f32.gmra.mxu0 %vm231_vm0, %v4241_v60 }
  0x6d   : > { %3450 = vmatmul.mubr.msk.f32.gmra.mxu1 %vm231_vm0, %v2984_v59  ;;  %3506 = vmatprep.mubr.msk.f32.mxu0 %vm231_vm0, %v3969_v13 }
  0x6e   : > { %3480 = vmatprep.mubr.msk.f32.mxu1 %vm231_vm0, %v4022_v26 }
  0x70   : > { %3507 = vmatmul.mubr.msk.f32.vlgmr.msra.gmra.mxu0 %vm231_vm0, %v3983_v15 }
  0x71   : > { %3481 = vmatmul.mubr.msk.f32.vlgmr.msra.gmra.mxu1 %vm231_vm0, %v4038_v30  ;;  %3557 = vmatpush3.msra.mxu0 %v3152_v56 }
  0x72   : > { %3531 = vmatpush3.msra.mxu1 %v3119_v55  ;;  %3483 = vmatprep.mubr.msk.f32.mxu1 %vm231_vm0, %v4048_v32 }
  0x73   : > { %3509 = vmatprep.mubr.msk.f32.mxu0 %vm231_vm0, %v3989_v17 }
  0x74   : > { %3510 = vmatmul.mubr.msk.f32.gmra.mxu0 %vm231_vm0, %v4003_v19 }
  0x75   : > { %3484 = vmatmul.mubr.msk.f32.gmra.mxu1 %vm231_vm0, %v4063_v34  ;;  %3512 = vmatprep.mubr.msk.f32.mxu0 %vm231_vm0, %v3934_v4  ;;  %v3151_v4 = vld [vmem:[%s3930_s6 + $0xe2] sm:$0xff]  ;;  %s4819_s6 = scalar_lea.sflag [#allocation4], %s202_s11 }
  0x76   : > { %3486 = vmatprep.mubr.msk.f32.mxu1 %vm231_vm0, %v4069_v36 }
  0x78   : > { %3513 = vmatmul.mubr.msk.f32.gmra.mxu0 %vm231_vm0, %v3941_v6 }
  0x79   : > { %3487 = vmatmul.mubr.msk.f32.gmra.mxu1 %vm231_vm0, %v4083_v38  ;;  %3515 = vmatprep.mubr.msk.f32.mxu0 %vm231_vm0, %v3947_v8 }
  0x7a   : > { %3489 = vmatprep.mubr.msk.f32.mxu1 %vm231_vm0, %v4089_v40 }
  0x7c   : > { %3516 = vmatmul.mubr.msk.f32.gmra.mxu0 %vm231_vm0, %v3962_v12 }
  0x7d   : > { %3490 = vmatmul.mubr.msk.f32.gmra.mxu1 %vm231_vm0, %v4103_v42  ;;  %3518 = vmatprep.mubr.msk.f32.mxu0 %vm231_vm0, %v3972_v14 }
  0x7e   : > { %3492 = vmatprep.mubr.msk.f32.mxu1 %vm231_vm0, %v4109_v44 }
  0x80   : > { %3519 = vmatmul.mubr.msk.f32.gmra.mxu0 %vm231_vm0, %v3986_v16 }
  0x81   : > { %3493 = vmatmul.mubr.msk.f32.gmra.mxu1 %vm231_vm0, %v4123_v46  ;;  %3521 = vmatprep.mubr.msk.f32.mxu0 %vm231_vm0, %v3992_v18 }
  0x82   : > { %3495 = vmatprep.mubr.msk.f32.mxu1 %vm231_vm0, %v4129_v48 }
  0x84   : > { %3522 = vmatmul.mubr.msk.f32.gmra.mxu0 %vm231_vm0, %v4006_v20 }
  0x85   : > { %3496 = vmatmul.mubr.msk.f32.gmra.mxu1 %vm231_vm0, %v4143_v50  ;;  %3524 = vmatprep.mubr.msk.f32.mxu0 %vm231_vm0, %v2983_v57 }
  0x86   : > { %3498 = vmatprep.mubr.msk.f32.mxu1 %vm231_vm0, %v4149_v52 }
  0x88   : > { %3525 = vmatmul.mubr.msk.f32.gmra.mxu0 %vm231_vm0, %v2984_v59 }
  0x89   : > { %3499 = vmatmul.mubr.msk.f32.gmra.mxu1 %vm231_vm0, %v4163_v54  ;;  %3527 = vmatprep.mubr.msk.f32.mxu0 %vm231_vm0, %v3084_v62 }
  0x8a   : > { %3501 = vmatprep.mubr.msk.f32.mxu1 %vm231_vm0, %v3049_v61 }
  0x8c   : > { %3528 = vmatmul.mubr.msk.f32.gmra.mxu0 %vm231_vm0, %v3085_v0 }
  0x8d   : > { %3502 = vmatmul.mubr.msk.f32.gmra.mxu1 %vm231_vm0, %v3050_v63  ;;  %3558 = vmatprep.mubr.msk.f32.mxu0 %vm231_vm0, %v4048_v32 }
  0x8e   : > { %3532 = vmatprep.mubr.msk.f32.mxu1 %vm231_vm0, %v4045_v31 }
  0x90   : > { %3559 = vmatmul.mubr.msk.f32.vlgmr.msra.gmra.mxu0 %vm231_vm0, %v4063_v34 }
  0x91   : > { %3533 = vmatmul.mubr.msk.f32.vlgmr.msra.gmra.mxu1 %vm231_vm0, %v4060_v33  ;;  %3561 = vmatprep.mubr.msk.f32.mxu0 %vm231_vm0, %v4069_v36 }
  0x92   : > { %3535 = vmatprep.mubr.msk.f32.mxu1 %vm231_vm0, %v4066_v35 }
  0x94   : > { %3562 = vmatmul.mubr.msk.f32.gmra.mxu0 %vm231_vm0, %v4083_v38 }
  0x95   : > { %3536 = vmatmul.mubr.msk.f32.gmra.mxu1 %vm231_vm0, %v4080_v37  ;;  %3564 = vmatprep.mubr.msk.f32.mxu0 %vm231_vm0, %v4089_v40 }
  0x96   : > { %3538 = vmatprep.mubr.msk.f32.mxu1 %vm231_vm0, %v4086_v39 }
  0x98   : > { %3565 = vmatmul.mubr.msk.f32.gmra.mxu0 %vm231_vm0, %v4103_v42 }
  0x99   : > { %3539 = vmatmul.mubr.msk.f32.gmra.mxu1 %vm231_vm0, %v4100_v41  ;;  %3567 = vmatprep.mubr.msk.f32.mxu0 %vm231_vm0, %v4109_v44 }
  0x9a   : > { %3541 = vmatprep.mubr.msk.f32.mxu1 %vm231_vm0, %v4106_v43 }
  0x9c   : > { %3568 = vmatmul.mubr.msk.f32.gmra.mxu0 %vm231_vm0, %v4123_v46 }
  0x9d   : > { %3542 = vmatmul.mubr.msk.f32.gmra.mxu1 %vm231_vm0, %v4120_v45  ;;  %3570 = vmatprep.mubr.msk.f32.mxu0 %vm231_vm0, %v4129_v48 }
  0x9e   : > { %3544 = vmatprep.mubr.msk.f32.mxu1 %vm231_vm0, %v4126_v47 }
  0xa0   : > { %3571 = vmatmul.mubr.msk.f32.gmra.mxu0 %vm231_vm0, %v4143_v50 }
  0xa1   : > { %3545 = vmatmul.mubr.msk.f32.gmra.mxu1 %vm231_vm0, %v4140_v49  ;;  %3573 = vmatprep.mubr.msk.f32.mxu0 %vm231_vm0, %v4149_v52 }
  0xa2   : > { %3547 = vmatprep.mubr.msk.f32.mxu1 %vm231_vm0, %v4146_v51 }
  0xa4   : > { %3574 = vmatmul.mubr.msk.f32.gmra.mxu0 %vm231_vm0, %v4163_v54 }
  0xa5   : > { %3548 = vmatmul.mubr.msk.f32.gmra.mxu1 %vm231_vm0, %v4160_v53  ;;  %3576 = vmatprep.mubr.msk.f32.mxu0 %vm231_vm0, %v3049_v61 }
  0xa6   : > { %3550 = vmatprep.mubr.msk.f32.mxu1 %vm231_vm0, %v4230_v58 }
  0xa8   : > { %3577 = vmatmul.mubr.msk.f32.gmra.mxu0 %vm231_vm0, %v3050_v63 }
  0xa9   : > { %3551 = vmatmul.mubr.msk.f32.gmra.mxu1 %vm231_vm0, %v4241_v60  ;;  %3579 = vmatprep.mubr.msk.f32.mxu0 %vm231_vm0, %v3150_v2 }
  0xaa   : > { %3553 = vmatprep.mubr.msk.f32.mxu1 %vm231_vm0, %v3117_v1 }
  0xac   : > { %3580 = vmatmul.mubr.msk.f32.gmra.mxu0 %vm231_vm0, %v3151_v4 }
  0xad   : > { %3554 = vmatmul.mubr.msk.f32.gmra.mxu1 %vm231_vm0, %v3118_v3 }
  0xe0   : > { %v3352_v5 = vpop.f32.mrf.mxu0 }
  0xe1   : > { %v3364_v6 = vpop.f32.mrf.mxu1 }
  0xe2   : > { %v346_v7 = vpop.f32.mrf.mxu0 }
  0xe3   : > { %v386_v8 = vpop.f32.mrf.mxu1 }
  0xe4   : > { %v3355_v9 = vpop.f32.mrf.mxu0 }
  0xe5   : > { %v3367_v10 = vpop.f32.mrf.mxu1 }
  0xe6   : > { %v356_v11 = vpop.f32.mrf.mxu0 }
  0xe7   : > { %v396_v12 = vpop.f32.mrf.mxu1 }
  0xe8   : > { %v3358_v13 = vpop.f32.mrf.mxu0 }
  0xe9   : > { %v3370_v14 = vpop.f32.mrf.mxu1 }
  0xea   : > { %v366_v15 = vpop.f32.mrf.mxu0 }
  0xeb   : > { %v406_v16 = vpop.f32.mrf.mxu1 }
  0xec   : > { %v3361_v17 = vpop.f32.mrf.mxu0 }
  0xed   : > { %v3373_v18 = vpop.f32.mrf.mxu1 }
  0xee   : > { %v376_v19 = vpop.f32.mrf.mxu0 }
  0xef   : > { %v4370_v20 = vpop.f32.mrf.mxu1 }
  0xf0   : > { %v3404_v22 = vpop.f32.mrf.mxu0 }
  0xf1   : > { %v3378_v21 = vpop.f32.mrf.mxu1 }
  0xf2   : > { %v669_v23 = vadd.f32 %v3378_v21, %v3352_v5  ;;  %v832_v25 = vpop.f32.mrf.mxu0 }
  0xf3   : > { %v573_v24 = vpop.f32.mrf.mxu1 }
  0xf4   : > { %v4372_v26 = vadd.f32 %v3404_v22, %v669_v23  ;;  %v668_v27 = vadd.f32 %v573_v24, %v346_v7  ;;  %v3407_v29 = vpop.f32.mrf.mxu0 }
  0xf5   : > { %v3381_v28 = vpop.f32.mrf.mxu1 }
  0xf6   : > { %v4374_v30 = vadd.f32 %v832_v25, %v668_v27  ;;  %v671_v31 = vadd.f32 %v3381_v28, %v3355_v9  ;;  %v842_v33 = vpop.f32.mrf.mxu0 }
  0xf7   : > { %v583_v32 = vpop.f32.mrf.mxu1 }
  0xf8   : > { %v4376_v34 = vadd.f32 %v3407_v29, %v671_v31  ;;  %v670_v35 = vadd.f32 %v583_v32, %v356_v11  ;;  %v3410_v37 = vpop.f32.mrf.mxu0 }
  0xf9   : > { %v3384_v36 = vpop.f32.mrf.mxu1 }
  0xfa   : > { %v4378_v38 = vadd.f32 %v842_v33, %v670_v35  ;;  %v673_v39 = vadd.f32 %v3384_v36, %v3358_v13  ;;  %v852_v41 = vpop.f32.mrf.mxu0 }
  0xfb   : > { %v593_v40 = vpop.f32.mrf.mxu1 }
  0xfc   : > { %v4380_v42 = vadd.f32 %v3410_v37, %v673_v39  ;;  %v672_v43 = vadd.f32 %v593_v40, %v366_v15  ;;  %v3413_v45 = vpop.f32.mrf.mxu0 }
  0xfd   : > { %v3387_v44 = vpop.f32.mrf.mxu1 }
  0xfe   : > { %v4382_v46 = vadd.f32 %v852_v41, %v672_v43  ;;  %v675_v47 = vadd.f32 %v3387_v44, %v3361_v17  ;;  %v862_v49 = vpop.f32.mrf.mxu0 }
  0xff   : > { %v603_v48 = vpop.f32.mrf.mxu1 }
 0x100   : > { %v4384_v50 = vadd.f32 %v3413_v45, %v675_v47  ;;  %v674_v51 = vadd.f32 %v603_v48, %v376_v19  ;;  %v3416_v53 = vpop.f32.mrf.mxu0 }
 0x101   : > { %v3390_v52 = vpop.f32.mrf.mxu1 }
 0x102   : > { %v4386_v54 = vadd.f32 %v862_v49, %v674_v51  ;;  %v677_v55 = vadd.f32 %v3390_v52, %v3364_v6  ;;  %v872_v57 = vpop.f32.mrf.mxu0 }
 0x103   : > { %v613_v56 = vpop.f32.mrf.mxu1 }
 0x104   : > { %v4388_v58 = vadd.f32 %v3416_v53, %v677_v55  ;;  %v676_v59 = vadd.f32 %v613_v56, %v386_v8  ;;  %v3419_v61 = vpop.f32.mrf.mxu0 }
 0x105   : > { %v3393_v60 = vpop.f32.mrf.mxu1 }
 0x106   : > { %v4390_v62 = vadd.f32 %v872_v57, %v676_v59  ;;  %v679_v63 = vadd.f32 %v3393_v60, %v3367_v10  ;;  %v882_v1 = vpop.f32.mrf.mxu0 }
 0x107   : > { %v623_v0 = vpop.f32.mrf.mxu1 }
 0x108   : > { %v4392_v2 = vadd.f32 %v3419_v61, %v679_v63  ;;  %v678_v3 = vadd.f32 %v623_v0, %v396_v12  ;;  %v3422_v5 = vpop.f32.mrf.mxu0 }
 0x109   : > { %v3396_v4 = vpop.f32.mrf.mxu1 }
 0x10a   : > { %v4394_v7 = vadd.f32 %v882_v1, %v678_v3  ;;  %v681_v6 = vadd.f32 %v3396_v4, %v3370_v14  ;;  %v892_v11 = vpop.f32.mrf.mxu0 }
 0x10b   : > { %v633_v9 = vpop.f32.mrf.mxu1 }
 0x10c   : > { %v4396_v13 = vadd.f32 %v3422_v5, %v681_v6  ;;  %v680_v8 = vadd.f32 %v633_v9, %v406_v16  ;;  %v3425_v17 = vpop.f32.mrf.mxu0 }
 0x10d   : > { %v3399_v15 = vpop.f32.mrf.mxu1 }
 0x10e   : > { %v4398_v19 = vadd.f32 %v892_v11, %v680_v8  ;;  %v683_v10 = vadd.f32 %v3399_v15, %v3373_v18  ;;  %v902_v22 = vpop.f32.mrf.mxu0 }
 0x10f   : > { %v643_v21 = vpop.f32.mrf.mxu1 }
 0x110   : > { %v942_v23 = vadd.f32 %v3425_v17, %v683_v10  ;;  %v682_v12 = vadd.f32 %v643_v21, %v4370_v20  ;;  %v4401_v25 = vpop.f32.mrf.mxu0 }
 0x111   : > { %v3430_v24 = vpop.f32.mrf.mxu1 }
 0x112   : > { %v941_v27 = vadd.f32 %v902_v22, %v682_v12  ;;  %v4403_v28 = vpop.f32.mrf.mxu0 }
 0x113   : > { %v1094_v14 = vpop.f32.mrf.mxu1 }
 0x114   : > { %v4405_v31 = vpop.f32.mrf.mxu0 }
 0x115   : > { %v3433_v29 = vpop.f32.mrf.mxu1 }
 0x116   : > { %v4409_v32 = vpop.f32.mrf.mxu0 }
 0x117   : > { %v4407_v16 = vpop.f32.mrf.mxu1 }
 0x118   : > { %v4413_v33 = vpop.f32.mrf.mxu0 }
 0x119   : > { %v4411_v18 = vpop.f32.mrf.mxu1 }
 0x11a   : > { %v4415_v20 = vpop.f32.mrf.mxu0 }
 0x11b   : > { %v1114_v35 = vpop.f32.mrf.mxu1 }
 0x11c   : > { %v4417_v37 = vpop.f32.mrf.mxu0 }
 0x11d   : > { %v3439_v36 = vpop.f32.mrf.mxu1 }
 0x11e   : > { %v4421_v40 = vpop.f32.mrf.mxu0 }
 0x11f   : > { %v4419_v39 = vpop.f32.mrf.mxu1 }
 0x120   : > { %v4425_v43 = vpop.f32.mrf.mxu0 }
 0x121   : > { %v4423_v41 = vpop.f32.mrf.mxu1 }
 0x122   : > { %v4427_v45 = vpop.f32.mrf.mxu0 }
 0x123   : > { %v1134_v44 = vpop.f32.mrf.mxu1 }
 0x124   : > { %v4431_v48 = vpop.f32.mrf.mxu0 }
 0x125   : > { %v4429_v47 = vpop.f32.mrf.mxu1 }
 0x126   : > { %v4435_v51 = vpop.f32.mrf.mxu0 }
 0x127   : > { %v4433_v49 = vpop.f32.mrf.mxu1 }
 0x128   : > { %v4439_v53 = vpop.f32.mrf.mxu0 }
 0x129   : > { %v4437_v52 = vpop.f32.mrf.mxu1 }
 0x12a   : > { %v4443_v56 = vpop.f32.mrf.mxu0 }
 0x12b   : > { %v4441_v55 = vpop.f32.mrf.mxu1 }
 0x12c   : > { %v3477_v59 = vpop.f32.mrf.mxu0 }
 0x12d   : > { %v3451_v57 = vpop.f32.mrf.mxu1 }
 0x12e   : > { %v1204_v60 = vadd.f32 %v3451_v57, %v942_v23  ;;  %v1423_v63 = vpop.f32.mrf.mxu0 }
 0x12f   : > { %v1164_v61 = vpop.f32.mrf.mxu1 }
 0x130   : > { %v4445_v0 = vadd.f32 %v3477_v59, %v1204_v60  ;;  %v1203_v1 = vadd.f32 %v1164_v61, %v941_v27  ;;  %v3508_v4 = vpop.f32.mrf.mxu0 }
 0x131   : > { %v3482_v3 = vpop.f32.mrf.mxu1 }
 0x132   : > { %4877 = vst [vmem:[#allocation6_spill] sm:$0xff] %v4445_v0  ;;  %v4447_v5 = vadd.f32 %v1423_v63, %v1203_v1  ;;  %v1874_v9 = vpop.f32.mrf.mxu0 }
 0x133   : > { %v1612_v6 = vpop.f32.mrf.mxu1 }
 0x134   : > { %4878 = vst [vmem:[#allocation7_spill] sm:$0xff] %v4447_v5  ;;  %v4449_v8 = vpop.f32.mrf.mxu0 }
 0x135   : > { %v3485_v11 = vpop.f32.mrf.mxu1 }
 0x136   : > { %v4451_v17 = vpop.f32.mrf.mxu0 }
 0x137   : > { %v1622_v15 = vpop.f32.mrf.mxu1 }
 0x138   : > { %v4455_v21 = vpop.f32.mrf.mxu0 }
 0x139   : > { %v4453_v10 = vpop.f32.mrf.mxu1  ;;  %4879 = vst [vmem:[#allocation8_spill] sm:$0xff] %v4455_v21 }
 0x13a   : > { %v4459_v23 = vpop.f32.mrf.mxu0 }
 0x13b   : > { %v4457_v22 = vpop.f32.mrf.mxu1  ;;  %4880 = vst [vmem:[#allocation9_spill] sm:$0xff] %v4459_v23  ;;  %v1190_v23 = vadd.f32 %v3430_v24, %v4372_v26  ;;  %v1191_v24 = vadd.f32 %v4407_v16, %v4378_v38  ;;  %v1198_v38 = vadd.f32 %v4423_v41, %v4388_v58  ;;  %v1197_v16 = vadd.f32 %v1134_v44, %v4390_v62 }
 0x13c   : > { %v4463_v27 = vpop.f32.mrf.mxu0  ;;  %v1199_v58 = vadd.f32 %v4433_v49, %v4394_v7  ;;  %v4536_v7 = vld [vmem:[%s4872_s2] ss:$0 sm:$0xff] }
 0x13d   : > { %v4461_v12 = vpop.f32.mrf.mxu1  ;;  %4881 = vst [vmem:[#allocation10_spill] sm:$0xff] %v4463_v27 }
 0x13e   : > { %v4467_v59 = vpop.f32.mrf.mxu0 }
 0x13f   : > { %v4465_v57 = vpop.f32.mrf.mxu1  ;;  %4883 = vst [vmem:[#allocation12_spill] sm:$0xff] %v4467_v59  ;;  %v1189_v59 = vadd.f32 %v1094_v14, %v4374_v30  ;;  %v1194_v30 = vadd.f32 %v4411_v18, %v4380_v42  ;;  %v1193_v14 = vadd.f32 %v1114_v35, %v4382_v46  ;;  %v1200_v18 = vadd.f32 %v4429_v47, %v4392_v2 }
 0x140   : > { %4882 = vst [vmem:[#allocation11_spill] sm:$0xff] %v4465_v57  ;;  %v4471_v61 = vpop.f32.mrf.mxu0  ;;  %v1457_v2 = vadd.f32 %v4425_v43, %v1198_v38  ;;  %v1456_v47 = vadd.f32 %v4427_v45, %v1197_v16  ;;  %v1458_v45 = vadd.f32 %v4435_v51, %v1199_v58 }
 0x141   : > { %v4469_v60 = vpop.f32.mrf.mxu1  ;;  %4885 = vst [vmem:[#allocation14_spill] sm:$0xff] %v4471_v61  ;;  %v1449_v61 = vadd.f32 %v4401_v25, %v1190_v23  ;;  %v1448_v26 = vadd.f32 %v4403_v28, %v1189_v59  ;;  %v1195_v28 = vadd.f32 %v4419_v39, %v4386_v54  ;;  %v1452_v54 = vadd.f32 %v4415_v20, %v1193_v14 }
 0x142   : > { %4884 = vst [vmem:[#allocation13_spill] sm:$0xff] %v4469_v60  ;;  %v4475_v1 = vpop.f32.mrf.mxu0  ;;  %v1201_v20 = vadd.f32 %v4441_v55, %v4398_v19  ;;  %v1459_v49 = vadd.f32 %v4431_v48, %v1200_v18  ;;  %v4547_v55 = vld [vmem:[%s4873_s3] ss:$0 sm:$0xff] }
 0x143   : > { %v4473_v63 = vpop.f32.mrf.mxu1  ;;  %4887 = vst [vmem:[#allocation16_spill] sm:$0xff] %v4475_v1  ;;  %v1192_v1 = vadd.f32 %v3433_v29, %v4376_v34  ;;  %v1707_v23 = vadd.f32 %v1612_v6, %v1448_v26  ;;  %v1454_v44 = vadd.f32 %v4421_v40, %v1195_v28 }
 0x144   : > { %4886 = vst [vmem:[#allocation15_spill] sm:$0xff] %v4473_v63  ;;  %v4479_v0 = vpop.f32.mrf.mxu0  ;;  %v4895_v38 = vld [vmem:[#allocation10_spill] sm:$0xff] }
 0x145   : > { %v4477_v5 = vpop.f32.mrf.mxu1  ;;  %v1451_v29 = vadd.f32 %v4405_v31, %v1192_v1 }
 0x146   : > { %4888 = vst [vmem:[#allocation17_spill] sm:$0xff] %v4477_v5  ;;  %v4484_v27 = vpop.f32.mrf.mxu0  ;;  %v4897_v58 = vld [vmem:[#allocation12_spill] sm:$0xff] }
 0x147   : > { %v4482_v21 = vpop.f32.mrf.mxu1  ;;  %4889 = vst [vmem:[#allocation18_spill] sm:$0xff] %v4484_v27  ;;  %v1708_v27 = vadd.f32 %v3482_v3, %v1449_v61  ;;  %v1710_v31 = vadd.f32 %v3485_v11, %v1451_v29  ;;  %v1969_v3 = vadd.f32 %v1874_v9, %v1707_v23  ;;  %v4893_v29 = vld [vmem:[#allocation8_spill] sm:$0xff]  ;;  %v4894_v23 = vld [vmem:[#allocation9_spill] sm:$0xff] }
 0x148   : > { %v4489_v60 = vpop.f32.mrf.mxu0 }
 0x149   : > { %v4487_v57 = vpop.f32.mrf.mxu1  ;;  %4890 = vst [vmem:[#allocation19_spill] sm:$0xff] %v4489_v60  ;;  %v1196_v60 = vadd.f32 %v3439_v36, %v4384_v50  ;;  %v1450_v50 = vadd.f32 %v4409_v32, %v1191_v24  ;;  %v1970_v35 = vadd.f32 %v3508_v4, %v1708_v27  ;;  %v1453_v36 = vadd.f32 %v4413_v33, %v1194_v30 }
 0x14a   : > { %v4495_v5 = vpop.f32.mrf.mxu0  ;;  %v1202_v33 = vadd.f32 %v4437_v52, %v4396_v13  ;;  %v1972_v4 = vadd.f32 %v4449_v8, %v1710_v31  ;;  %v1711_v52 = vadd.f32 %v4457_v22, %v1452_v54  ;;  %v4891_v22 = vld [vmem:[#allocation11_spill] sm:$0xff] }
 0x14b   : > { %v4493_v63 = vpop.f32.mrf.mxu1  ;;  %v1455_v39 = vadd.f32 %v4417_v37, %v1196_v60  ;;  %v1709_v32 = vadd.f32 %v1622_v15, %v1450_v50  ;;  %v1712_v13 = vadd.f32 %v4453_v10, %v1453_v36  ;;  %v4553_v10 = vadd.f32 %v4443_v56, %v1201_v20  ;;  %v4892_v60 = vld [vmem:[#allocation13_spill] sm:$0xff]  ;;  %v4896_v16 = vld [vmem:[#allocation15_spill] sm:$0xff] }
 0x14c   : > { %v4506_v34 = vpop.f32.mrf.mxu0  ;;  %v1461_v51 = vadd.f32 %v4439_v53, %v1202_v33  ;;  %v1716_v61 = vadd.f32 %v4892_v60, %v1457_v2  ;;  %v1973_v53 = vadd.f32 %v4894_v23, %v1711_v52  ;;  %v1715_v50 = vadd.f32 %v4896_v16, %v1456_v47 }
 0x14d   : > { %v4504_v25 = vpop.f32.mrf.mxu1  ;;  %v1714_v19 = vadd.f32 %v4461_v12, %v1455_v39  ;;  %v1971_v48 = vadd.f32 %v4451_v17, %v1709_v32  ;;  %v1713_v12 = vadd.f32 %v4891_v22, %v1454_v44  ;;  %v1974_v28 = vadd.f32 %v4893_v29, %v1712_v13 }
 0x14e   : > { %v4516_v46 = vpop.f32.mrf.mxu0 }
 0x14f   : > { %v4514_v42 = vpop.f32.mrf.mxu1  ;;  %v1976_v56 = vadd.f32 %v4895_v38, %v1714_v19  ;;  %v1720_v38 = vadd.f32 %v4487_v57, %v1461_v51 }
 0x150   : > { %v3560_v41 = vpop.f32.mrf.mxu0 }
 0x151   : > { %v3534_v62 = vpop.f32.mrf.mxu1 }
 0x152   : > { %v2229_v6 = vadd.f32 %v3534_v62, %v1970_v35  ;;  %v2392_v40 = vpop.f32.mrf.mxu0  ;;  %v1975_v62 = vadd.f32 %v4897_v58, %v1713_v12  ;;  %v1719_v58 = vadd.f32 %v4493_v63, %v4553_v10 }
 0x153   : > { %v2133_v37 = vpop.f32.mrf.mxu1 }
 0x154   : > { %v2488_v43 = vadd.f32 %v3560_v41, %v2229_v6  ;;  %v2228_v9 = vadd.f32 %v2133_v37, %v1969_v3  ;;  %v3563_v15 = vpop.f32.mrf.mxu0  ;;  %v4898_v41 = vld [vmem:[#allocation14_spill] sm:$0xff]  ;;  %v4899_v3 = vld [vmem:[#allocation17_spill] sm:$0xff] }
 0x155   : > { %v3537_v11 = vpop.f32.mrf.mxu1  ;;  %v1978_v44 = vadd.f32 %v4898_v41, %v1716_v61  ;;  %v1718_v32 = vadd.f32 %v4899_v3, %v1459_v49 }
 0x156   : > { %v2543_v8 = vmul.f32 %v4536_v7, %v2488_v43  ;;  %v2487_v27 = vadd.f32 %v2392_v40, %v2228_v9  ;;  %v2231_v59 = vadd.f32 %v3537_v11, %v1972_v4  ;;  %v2402_v26 = vpop.f32.mrf.mxu0  ;;  %v4900_v4 = vld [vmem:[#allocation16_spill] sm:$0xff]  ;;  %v1717_v9 = vadd.f32 %v4482_v21, %v1458_v45 }
 0x157   : > { %v2143_v1 = vpop.f32.mrf.mxu1  ;;  %v1977_v43 = vadd.f32 %v4900_v4, %v1715_v50 }
 0x158   : > { %v4558_v24 = vadd.f32 %v4547_v55, %v2543_v8  ;;  %v2542_v17 = vmul.f32 %v4536_v7, %v2487_v27  ;;  %v2490_v30 = vadd.f32 %v3563_v15, %v2231_v59  ;;  %v2230_v14 = vadd.f32 %v2143_v1, %v1971_v48  ;;  %v3566_v35 = vpop.f32.mrf.mxu0  ;;  %v4901_v1 = vld [vmem:[#allocation18_spill] sm:$0xff] }
 0x159   : > { %v3540_v18 = vpop.f32.mrf.mxu1  ;;  %v1980_v8 = vadd.f32 %v4479_v0, %v1718_v32 }
 0x15a   : > { %v2582_v31 = vmin.f32 %v4558_v24, 20.0  ;;  %v4567_v36 = vadd.f32 %v4547_v55, %v2542_v17  ;;  %v2545_v54 = vmul.f32 %v4536_v7, %v2490_v30  ;;  %v2489_v39 = vadd.f32 %v2402_v26, %v2230_v14  ;;  %v2412_v33 = vpop.f32.mrf.mxu0 }
 0x15b   : > { %v2233_v6 = vadd.f32 %v3540_v18, %v1974_v28  ;;  %v2153_v2 = vpop.f32.mrf.mxu1  ;;  %v1979_v26 = vadd.f32 %v4901_v1, %v1717_v9 }
 0x15c   : > { %v2599_v47 = vmul.f32 1.442695, %v2582_v31  ;;  %v2581_v20 = vmin.f32 %v4567_v36, 20.0  ;;  %v4575_v37 = vadd.f32 %v4547_v55, %v2545_v54  ;;  %v2544_v40 = vmul.f32 %v4536_v7, %v2489_v39  ;;  %v3569_v11 = vpop.f32.mrf.mxu0 }
 0x15d   : > { %v2492_v13 = vadd.f32 %v3566_v35, %v2233_v6  ;;  %v2232_v52 = vadd.f32 %v2153_v2, %v1973_v53  ;;  %v3543_v19 = vpop.f32.mrf.mxu1 }
 0x15e   : > { %3658 = vpow2.f32 %v2599_v47  ;;  %v2597_v49 = vmul.f32 1.442695, %v2581_v20  ;;  %v2584_v15 = vmin.f32 %v4575_v37, 20.0  ;;  %v4582_v48 = vadd.f32 %v4547_v55, %v2544_v40  ;;  %v2422_v60 = vpop.f32.mrf.mxu0 }
 0x15f   : > { %v2547_v27 = vmul.f32 %v4536_v7, %v2492_v13  ;;  %v2491_v59 = vadd.f32 %v2412_v33, %v2232_v52  ;;  %v2235_v22 = vadd.f32 %v3543_v19, %v1976_v56  ;;  %v2163_v12 = vpop.f32.mrf.mxu1  ;;  %v4902_v33 = vld [vmem:[#allocation19_spill] sm:$0xff]  ;;  %v1981_v52 = vadd.f32 %v4495_v5, %v1719_v58 }
 0x160   : > { %3660 = vpow2.f32 %v2597_v49  ;;  %v2603_v21 = vmul.f32 1.442695, %v2584_v15  ;;  %v2583_v45 = vmin.f32 %v4582_v48, 20.0  ;;  %v2234_v61 = vadd.f32 %v2163_v12, %v1975_v62  ;;  %v3572_v29 = vpop.f32.mrf.mxu0  ;;  %v4903_v12 = vld [vmem:[#allocation6_spill] sm:$0xff] }
 0x161   : > { %v4589_v17 = vadd.f32 %v4547_v55, %v2547_v27  ;;  %v2546_v30 = vmul.f32 %v4536_v7, %v2491_v59  ;;  %v2494_v14 = vadd.f32 %v3569_v11, %v2235_v22  ;;  %v3546_v0 = vpop.f32.mrf.mxu1  ;;  %v1982_v47 = vadd.f32 %v4902_v33, %v1720_v38 }
 0x162   : > { %3662 = vpow2.f32 %v2603_v21  ;;  %v2601_v28 = vmul.f32 1.442695, %v2583_v45  ;;  %v2493_v23 = vadd.f32 %v2422_v60, %v2234_v61  ;;  %v2237_v53 = vadd.f32 %v3546_v0, %v1978_v44  ;;  %v2432_v35 = vpop.f32.mrf.mxu0 }
 0x163   : > { %v2586_v56 = vmin.f32 %v4589_v17, 20.0  ;;  %v4595_v16 = vadd.f32 %v4547_v55, %v2546_v30  ;;  %v2549_v50 = vmul.f32 %v4536_v7, %v2494_v14  ;;  %v2173_v18 = vpop.f32.mrf.mxu1  ;;  %v1722_v60 = vadd.f32 %v4504_v25, %v4903_v12 }
 0x164   : > { %3664 = vpow2.f32 %v2601_v28  ;;  %v2548_v31 = vmul.f32 %v4536_v7, %v2493_v23  ;;  %v2496_v54 = vadd.f32 %v3572_v29, %v2237_v53  ;;  %v2236_v39 = vadd.f32 %v2173_v18, %v1977_v43  ;;  %v3575_v44 = vpop.f32.mrf.mxu0 }
 0x165   : > { %v2607_v62 = vmul.f32 1.442695, %v2586_v56  ;;  %v2585_v57 = vmin.f32 %v4595_v16, 20.0  ;;  %v4603_v51 = vadd.f32 %v4547_v55, %v2549_v50  ;;  %v3549_v41 = vpop.f32.mrf.mxu1  ;;  %v4904_v50 = vld [vmem:[#allocation7_spill] sm:$0xff]  ;;  %v1984_v33 = vadd.f32 %v4506_v34, %v1722_v60 }
 0x166   : > { %v4606_v3 = vadd.f32 %v4547_v55, %v2548_v31  ;;  %v2551_v32 = vmul.f32 %v4536_v7, %v2496_v54  ;;  %v2495_v6 = vadd.f32 %v2432_v35, %v2236_v39  ;;  %v2239_v2 = vadd.f32 %v3549_v41, %v1980_v8  ;;  %v2442_v40 = vpop.f32.mrf.mxu0 }
 0x167   : > { %3666 = vpow2.f32 %v2607_v62  ;;  %v2605_v20 = vmul.f32 1.442695, %v2585_v57  ;;  %v2588_v63 = vmin.f32 %v4603_v51, 20.0  ;;  %v2183_v10 = vpop.f32.mrf.mxu1  ;;  %v1721_v18 = vadd.f32 %v4514_v42, %v4904_v50 }
 0x168   : > { %v2587_v4 = vmin.f32 %v4606_v3, 20.0  ;;  %v4613_v43 = vadd.f32 %v4547_v55, %v2551_v32  ;;  %v2550_v9 = vmul.f32 %v4536_v7, %v2495_v6  ;;  %v2498_v13 = vadd.f32 %v3575_v44, %v2239_v2  ;;  %v3578_v5 = vpop.f32.mrf.mxu0 }
 0x169   : > { %3668 = vpow2.f32 %v2605_v20  ;;  %v2611_v19 = vmul.f32 1.442695, %v2588_v63  ;;  %v2238_v11 = vadd.f32 %v2183_v10, %v1979_v26  ;;  %v3552_v49 = vpop.f32.mrf.mxu1 }
 0x16a   : > { %v2609_v15 = vmul.f32 1.442695, %v2587_v4  ;;  %v2590_v8 = vmin.f32 %v4613_v43, 20.0  ;;  %v4619_v27 = vadd.f32 %v4547_v55, %v2550_v9  ;;  %v2553_v59 = vmul.f32 %v4536_v7, %v2498_v13  ;;  %v2452_v39 = vpop.f32.mrf.mxu0 }
 0x16b   : > { %v3659_v22 = vpop.eup %3658  ;;  %3670 = vpow2.f32 %v2611_v19  ;;  %v2497_v21 = vadd.f32 %v2442_v40, %v2238_v11  ;;  %v2241_v45 = vadd.f32 %v3552_v49, %v1982_v47  ;;  %v2193_v61 = vpop.f32.mrf.mxu1 }
 0x16c   : > { %v2630_v1 = vadd.f32 1.0, %v3659_v22  ;;  %3672 = vpow2.f32 %v2609_v15  ;;  %v2615_v26 = vmul.f32 1.442695, %v2590_v8  ;;  %v2589_v30 = vmin.f32 %v4619_v27, 20.0  ;;  %v3581_v4 = vpop.f32.mrf.mxu0 }
 0x16d   : > { %v3661_v14 = vpop.eup %3660  ;;  %v4626_v0 = vadd.f32 %v4547_v55, %v2553_v59  ;;  %v2552_v29 = vmul.f32 %v4536_v7, %v2497_v21  ;;  %v2500_v28 = vadd.f32 %v3578_v5, %v2241_v45  ;;  %v2240_v23 = vadd.f32 %v2193_v61, %v1981_v52  ;;  %v3555_v58 = vpop.f32.mrf.mxu1 }
 0x16e   : > { %v4629_v53 = vmul.f32 %v2630_v1, %v2630_v1  ;;  %v2629_v25 = vadd.f32 1.0, %v3661_v14  ;;  %3674 = vpow2.f32 %v2615_v26  ;;  %v2613_v38 = vmul.f32 1.442695, %v2589_v30  ;;  %v2462_v45 = vpop.f32.mrf.mxu0 }
 0x16f   : > { %v3663_v56 = vpop.eup %3662  ;;  %v2592_v35 = vmin.f32 %v4626_v0, 20.0  ;;  %v4635_v31 = vadd.f32 %v4547_v55, %v2552_v29  ;;  %v2555_v54 = vmul.f32 %v4536_v7, %v2500_v28  ;;  %v2499_v44 = vadd.f32 %v2452_v39, %v2240_v23  ;;  %v2203_v9 = vpop.f32.mrf.mxu1 }
 0x170   : > { %v4639_v62 = vadd.f32 1.0, %v4629_v53  ;;  %v4641_v57 = vmul.f32 %v2629_v25, %v2629_v25  ;;  %v2632_v41 = vadd.f32 1.0, %v3663_v56  ;;  %3676 = vpow2.f32 %v2613_v38 }
 0x171   : > { %v3665_v32 = vpop.eup %3664  ;;  %v2619_v6 = vmul.f32 1.442695, %v2592_v35  ;;  %v2591_v42 = vmin.f32 %v4635_v31, 20.0  ;;  %v4645_v2 = vadd.f32 %v4547_v55, %v2555_v54  ;;  %v1983_v52 = vadd.f32 %v4516_v46, %v1721_v18 }
 0x172   : > { %3678 = vrcp.f32 %v4639_v62  ;;  %v4650_v47 = vadd.f32 1.0, %v4641_v57  ;;  %v4652_v20 = vmul.f32 %v2632_v41, %v2632_v41  ;;  %v2631_v63 = vadd.f32 1.0, %v3665_v32 }
 0x173   : > { %3680 = vpow2.f32 %v2619_v6  ;;  %v2617_v10 = vmul.f32 1.442695, %v2591_v42  ;;  %v2594_v40 = vmin.f32 %v4645_v2, 20.0  ;;  %v2554_v19 = vmul.f32 %v4536_v7, %v2499_v44 }
 0x174   : > { %v3667_v13 = vpop.eup %3666  ;;  %3682 = vrcp.f32 %v4650_v47  ;;  %v4658_v34 = vadd.f32 1.0, %v4652_v20  ;;  %v4661_v11 = vmul.f32 %v2631_v63, %v2631_v63  ;;  %v2243_v22 = vadd.f32 %v3555_v58, %v1984_v33 }
 0x175   : > { %v2634_v49 = vadd.f32 1.0, %v3667_v13  ;;  %3684 = vpow2.f32 %v2617_v10  ;;  %v2623_v15 = vmul.f32 1.442695, %v2594_v40  ;;  %v4665_v59 = vadd.f32 %v4547_v55, %v2554_v19 }
 0x176   : > { %v3669_v8 = vpop.eup %3668  ;;  %3686 = vrcp.f32 %v4658_v34  ;;  %v2242_v46 = vadd.f32 %v2203_v9, %v1983_v52  ;;  %v4668_v12 = vadd.f32 1.0, %v4661_v11  ;;  %v2502_v1 = vadd.f32 %v3581_v4, %v2243_v22 }
 0x177   : > { %v4670_v60 = vmul.f32 %v2634_v49, %v2634_v49  ;;  %v2633_v21 = vadd.f32 1.0, %v3669_v8  ;;  %3688 = vpow2.f32 %v2623_v15  ;;  %v2593_v61 = vmin.f32 %v4665_v59, 20.0 }
 0x178   : > { %v3671_v5 = vpop.eup %3670  ;;  %v2501_v26 = vadd.f32 %v2462_v45, %v2242_v46  ;;  %3690 = vrcp.f32 %v4668_v12  ;;  %v2557_v38 = vmul.f32 %v4536_v7, %v2502_v1  ;;  %v3172_v40 = vadd.f32 -1.0, %v4629_v53 }
 0x179   : > { %v3673_v30 = vpop.eup %3672  ;;  %v4675_v14 = vadd.f32 1.0, %v4670_v60  ;;  %v4677_v29 = vmul.f32 %v2633_v21, %v2633_v21  ;;  %v2636_v28 = vadd.f32 1.0, %v3671_v5  ;;  %v2621_v25 = vmul.f32 1.442695, %v2593_v61 }
 0x17a   : > { %v2635_v23 = vadd.f32 1.0, %v3673_v30  ;;  %v2556_v18 = vmul.f32 %v4536_v7, %v2501_v26  ;;  %v4691_v58 = vadd.f32 %v4547_v55, %v2557_v38  ;;  %v3171_v53 = vadd.f32 -1.0, %v4641_v57 }
 0x17b   : > { %v3675_v56 = vpop.eup %3674  ;;  %3692 = vrcp.f32 %v4675_v14  ;;  %v4682_v50 = vadd.f32 1.0, %v4677_v29  ;;  %v4685_v35 = vmul.f32 %v2636_v28, %v2636_v28  ;;  %v3174_v57 = vadd.f32 -1.0, %v4652_v20 }
 0x17c   : > { %v4687_v54 = vmul.f32 %v2635_v23, %v2635_v23  ;;  %v2638_v39 = vadd.f32 1.0, %v3675_v56  ;;  %3694 = vpow2.f32 %v2621_v25  ;;  %v4702_v33 = vadd.f32 %v4547_v55, %v2556_v18 }
 0x17d   : > { %3696 = vrcp.f32 %v4682_v50  ;;  %v3677_v41 = vpop.eup %3676  ;;  %v4694_v44 = vadd.f32 1.0, %v4685_v35  ;;  %v2596_v55 = vmin.f32 %v4691_v58, 20.0 }
 0x17e   : > { %v4697_v32 = vadd.f32 1.0, %v4687_v54  ;;  %v4699_v6 = vmul.f32 %v2638_v39, %v2638_v39  ;;  %v2637_v42 = vadd.f32 1.0, %v3677_v41  ;;  %v2595_v46 = vmin.f32 %v4702_v33, 20.0 }
 0x17f   : > { %v3679_v7 = vpop.eup %3678  ;;  %3698 = vrcp.f32 %v4694_v44  ;;  %v2627_v26 = vmul.f32 1.442695, %v2596_v55 }
 0x180   : > { %v3681_v63 = vpop.eup %3680  ;;  %v2694_v10 = vmul.f32 %v3679_v7, %v4639_v62  ;;  %3700 = vrcp.f32 %v4697_v32  ;;  %v4710_v9 = vadd.f32 1.0, %v4699_v6  ;;  %v4712_v13 = vmul.f32 %v2637_v42, %v2637_v42 }
 0x181   : > { %v3683_v4 = vpop.eup %3682  ;;  %v2640_v49 = vadd.f32 1.0, %v3681_v63  ;;  %v2625_v20 = vmul.f32 1.442695, %v2595_v46 }
 0x182   : > { %v3685_v52 = vpop.eup %3684  ;;  %v2710_v19 = vsub.f32 2.0, %v2694_v10  ;;  %v2693_v62 = vmul.f32 %v3683_v4, %v4650_v47  ;;  %3702 = vrcp.f32 %v4710_v9  ;;  %v4719_v8 = vadd.f32 1.0, %v4712_v13 }
 0x183   : > { %v3687_v15 = vpop.eup %3686  ;;  %v2639_v22 = vadd.f32 1.0, %v3685_v52  ;;  %v4725_v61 = vmul.f32 %v2640_v49, %v2640_v49  ;;  %v3176_v49 = vadd.f32 -1.0, %v4670_v60 }
 0x184   : > { %v2726_v21 = vmul.f32 %v3679_v7, %v2710_v19  ;;  %v2709_v45 = vsub.f32 2.0, %v2693_v62  ;;  %v2696_v5 = vmul.f32 %v3687_v15, %v4658_v34  ;;  %v3689_v47 = vpop.eup %3688  ;;  %3704 = vrcp.f32 %v4719_v8 }
 0x185   : > { %v4729_v1 = vmul.f32 %v2639_v22, %v2639_v22  ;;  %v3691_v30 = vpop.eup %3690  ;;  %v4732_v38 = vadd.f32 1.0, %v4725_v61  ;;  %v3173_v34 = vadd.f32 -1.0, %v4661_v11 }
 0x186   : > { %v2758_v28 = vmul.f32 %v3172_v40, %v2726_v21  ;;  %v2725_v23 = vmul.f32 %v3683_v4, %v2709_v45  ;;  %v2712_v25 = vsub.f32 2.0, %v2696_v5  ;;  %v2695_v56 = vmul.f32 %v3691_v30, %v4668_v12 }
 0x187   : > { %v4737_v18 = vadd.f32 1.0, %v4729_v1  ;;  %3706 = vrcp.f32 %v4732_v38  ;;  %v2642_v12 = vadd.f32 1.0, %v3689_v47 }
 0x188   : > { %v3693_v39 = vpop.eup %3692  ;;  %v2774_v41 = vmul.f32 %v2758_v28, %v4558_v24  ;;  %v2757_v7 = vmul.f32 %v3171_v53, %v2725_v23  ;;  %v2728_v42 = vmul.f32 %v3687_v15, %v2712_v25  ;;  %v2711_v10 = vsub.f32 2.0, %v2695_v56 }
 0x189   : > { %v3695_v63 = vpop.eup %3694  ;;  %v2698_v40 = vmul.f32 %v3693_v39, %v4675_v14  ;;  %3708 = vrcp.f32 %v4737_v18  ;;  %v4748_v14 = vmul.f32 %v2642_v12, %v2642_v12 }
 0x18a   : > { %v3697_v4 = vpop.eup %3696  ;;  %2790 = vst [vmem:[%s4743_s13 + $0x8] sm:$0xff] %v2774_v41  ;;  %v2773_v11 = vmul.f32 %v2757_v7, %v4567_v36  ;;  %v2760_v24 = vmul.f32 %v3174_v57, %v2728_v42  ;;  %v2641_v55 = vadd.f32 1.0, %v3695_v63  ;;  %3710 = vpow2.f32 %v2627_v26 }
 0x18b   : > { %v2727_v52 = vmul.f32 %v3691_v30, %v2711_v10  ;;  %v2714_v19 = vsub.f32 2.0, %v2698_v40  ;;  %v2697_v62 = vmul.f32 %v3697_v4, %v4682_v50  ;;  %3712 = vpow2.f32 %v2625_v20 }
 0x18c   : > { %2789 = vst [vmem:[%s4743_s13] sm:$0xff] %v2773_v11  ;;  %v2776_v53 = vmul.f32 %v2760_v24, %v4575_v37  ;;  %v4753_v15 = vmul.f32 %v2641_v55, %v2641_v55  ;;  %v3699_v22 = vpop.eup %3698  ;;  %v4756_v45 = vadd.f32 1.0, %v4748_v14  ;;  %v3175_v50 = vadd.f32 -1.0, %v4677_v29 }
 0x18d   : > { %v2759_v36 = vmul.f32 %v3173_v34, %v2727_v52  ;;  %v2730_v46 = vmul.f32 %v3693_v39, %v2714_v19  ;;  %v2713_v21 = vsub.f32 2.0, %v2697_v62  ;;  %v3701_v5 = vpop.eup %3700  ;;  %v2700_v47 = vmul.f32 %v3699_v22, %v4694_v44 }
 0x18e   : > { %2792 = vst [vmem:[%s4743_s13 + $0x18] sm:$0xff] %v2776_v53  ;;  %v4762_v37 = vadd.f32 1.0, %v4753_v15  ;;  %v2699_v30 = vmul.f32 %v3701_v5, %v4697_v32  ;;  %3714 = vrcp.f32 %v4756_v45  ;;  %v3177_v39 = vadd.f32 -1.0, %v4687_v54 }
 0x18f   : > { %v2775_v60 = vmul.f32 %v2759_v36, %v4582_v48  ;;  %v2762_v57 = vmul.f32 %v3176_v49, %v2730_v46  ;;  %v2729_v26 = vmul.f32 %v3697_v4, %v2713_v21  ;;  %v3703_v28 = vpop.eup %3702  ;;  %v2716_v23 = vsub.f32 2.0, %v2700_v47 }
 0x190   : > { %v2715_v44 = vsub.f32 2.0, %v2699_v30  ;;  %v2702_v56 = vmul.f32 %v3703_v28, %v4710_v9  ;;  %v3178_v48 = vadd.f32 -1.0, %v4685_v35  ;;  %3716 = vrcp.f32 %v4762_v37 }
 0x191   : > { %2791 = vst [vmem:[%s4743_s13 + $0x10] sm:$0xff] %v2775_v60  ;;  %v2778_v25 = vmul.f32 %v2762_v57, %v4589_v17  ;;  %v2761_v29 = vmul.f32 %v3175_v50, %v2729_v26  ;;  %v3705_v34 = vpop.eup %3704  ;;  %v2732_v20 = vmul.f32 %v3699_v22, %v2716_v23  ;;  %v3180_v35 = vadd.f32 -1.0, %v4699_v6 }
 0x192   : > { %v2731_v41 = vmul.f32 %v3701_v5, %v2715_v44  ;;  %v2718_v7 = vsub.f32 2.0, %v2702_v56  ;;  %v2701_v17 = vmul.f32 %v3705_v34, %v4719_v8  ;;  %v3179_v4 = vadd.f32 -1.0, %v4712_v13 }
 0x193   : > { %2794 = vst [vmem:[%s4743_s13 + $0x28] sm:$0xff] %v2778_v25  ;;  %v2777_v32 = vmul.f32 %v2761_v29, %v4595_v16  ;;  %v2764_v42 = vmul.f32 %v3178_v48, %v2732_v20  ;;  %v3181_v46 = vadd.f32 -1.0, %v4729_v1  ;;  %v3183_v29 = vadd.f32 -1.0, %v4753_v15 }
 0x194   : > { %v3707_v63 = vpop.eup %3706  ;;  %v2763_v9 = vmul.f32 %v3177_v39, %v2731_v41  ;;  %v2734_v10 = vmul.f32 %v3703_v28, %v2718_v7  ;;  %v2717_v40 = vsub.f32 2.0, %v2701_v17 }
 0x195   : > { %2793 = vst [vmem:[%s4743_s13 + $0x20] sm:$0xff] %v2777_v32  ;;  %v2780_v12 = vmul.f32 %v2764_v42, %v4603_v51  ;;  %v2704_v16 = vmul.f32 %v3707_v63, %v4732_v38  ;;  %v3182_v38 = vadd.f32 -1.0, %v4725_v61 }
 0x196   : > { %v3709_v54 = vpop.eup %3708  ;;  %v2779_v8 = vmul.f32 %v2763_v9, %v4606_v3  ;;  %v2766_v24 = vmul.f32 %v3180_v35, %v2734_v10  ;;  %v2733_v55 = vmul.f32 %v3705_v34, %v2717_v40 }
 0x197   : > { %v3711_v11 = vpop.eup %3710  ;;  %v2703_v52 = vmul.f32 %v3709_v54, %v4737_v18  ;;  %2796 = vst [vmem:[%s4743_s13 + $0x38] sm:$0xff] %v2780_v12  ;;  %v2720_v19 = vsub.f32 2.0, %v2704_v16 }
 0x198   : > { %v2644_v62 = vadd.f32 1.0, %v3711_v11  ;;  %v3713_v6 = vpop.eup %3712  ;;  %2795 = vst [vmem:[%s4743_s13 + $0x30] sm:$0xff] %v2779_v8  ;;  %v2782_v51 = vmul.f32 %v2766_v24, %v4613_v43  ;;  %v2765_v53 = vmul.f32 %v3179_v4, %v2733_v55 }
 0x199   : > { %v2719_v13 = vsub.f32 2.0, %v2703_v52  ;;  %v2736_v49 = vmul.f32 %v3707_v63, %v2720_v19  ;;  %v2643_v3 = vadd.f32 1.0, %v3713_v6 }
 0x19a   : > { %v2660_v22 = vmul.f32 %v2644_v62, %v2644_v62  ;;  %2798 = vst [vmem:[%s4743_s13 + $0x48] sm:$0xff] %v2782_v51  ;;  %v2781_v36 = vmul.f32 %v2765_v53, %v4619_v27 }
 0x19b   : > { %v2735_v18 = vmul.f32 %v3709_v54, %v2719_v13  ;;  %v2768_v21 = vmul.f32 %v3182_v38, %v2736_v49  ;;  %v2659_v50 = vmul.f32 %v2643_v3, %v2643_v3  ;;  %v3715_v47 = vpop.eup %3714 }
 0x19c   : > { %v2676_v5 = vadd.f32 1.0, %v2660_v22  ;;  %2797 = vst [vmem:[%s4743_s13 + $0x40] sm:$0xff] %v2781_v36  ;;  %v2706_v61 = vmul.f32 %v3715_v47, %v4756_v45  ;;  %v3186_v39 = vadd.f32 -1.0, %v2660_v22 }
 0x19d   : > { %v2767_v43 = vmul.f32 %v3181_v46, %v2735_v18  ;;  %v2784_v60 = vmul.f32 %v2768_v21, %v4626_v0  ;;  %v2675_v57 = vadd.f32 1.0, %v2659_v50  ;;  %v3717_v26 = vpop.eup %3716  ;;  %v3184_v0 = vadd.f32 -1.0, %v4748_v14 }
 0x19e   : > { %3718 = vrcp.f32 %v2676_v5  ;;  %v2722_v1 = vsub.f32 2.0, %v2706_v61  ;;  %v2705_v30 = vmul.f32 %v3717_v26, %v4762_v37 }
 0x19f   : > { %v2783_v27 = vmul.f32 %v2767_v43, %v4635_v31  ;;  %2800 = vst [vmem:[%s4743_s13 + $0x58] sm:$0xff] %v2784_v60  ;;  %3720 = vrcp.f32 %v2675_v57 }
 0x1a0   : > { %v2738_v28 = vmul.f32 %v3715_v47, %v2722_v1  ;;  %v2721_v23 = vsub.f32 2.0, %v2705_v30 }
 0x1a1   : > { %2799 = vst [vmem:[%s4743_s13 + $0x50] sm:$0xff] %v2783_v27 }
 0x1a2   : > { %v2770_v45 = vmul.f32 %v3184_v0, %v2738_v28  ;;  %v2737_v25 = vmul.f32 %v3717_v26, %v2721_v23 }
 0x1a4   : > { %v2786_v44 = vmul.f32 %v2770_v45, %v4645_v2  ;;  %v2769_v31 = vmul.f32 %v3183_v29, %v2737_v25 }
 0x1a6   : > { %2802 = vst [vmem:[%s4743_s13 + $0x68] sm:$0xff] %v2786_v44  ;;  %v2785_v56 = vmul.f32 %v2769_v31, %v4665_v59  ;;  %v3185_v59 = vadd.f32 -1.0, %v2659_v50 }
 0x1a8   : > { %2801 = vst [vmem:[%s4743_s13 + $0x60] sm:$0xff] %v2785_v56 }
 0x1ab   : > { %v3719_v37 = vpop.eup %3718 }
 0x1ac   : > { %v2708_v34 = vmul.f32 %v3719_v37, %v2676_v5  ;;  %v3721_v20 = vpop.eup %3720 }
 0x1ad   : > { %v2707_v48 = vmul.f32 %v3721_v20, %v2675_v57 }
 0x1ae   : > { %v2724_v14 = vsub.f32 2.0, %v2708_v34 }
 0x1af   : > { %v2723_v2 = vsub.f32 2.0, %v2707_v48 }
 0x1b0   : > { %v2740_v15 = vmul.f32 %v3719_v37, %v2724_v14 }
 0x1b1   : > { %v2739_v41 = vmul.f32 %v3721_v20, %v2723_v2 }
 0x1b2   : > { %v2772_v32 = vmul.f32 %v3186_v39, %v2740_v15 }
 0x1b3   : > { %v2771_v17 = vmul.f32 %v3185_v59, %v2739_v41 }
 0x1b4   : > { %v2788_v7 = vmul.f32 %v2772_v32, %v4691_v58 }
 0x1b5   : > { %v2787_v42 = vmul.f32 %v2771_v17, %v4702_v33 }
 0x1b6   : > { %2804 = vst [vmem:[%s4743_s13 + $0x78] sm:$0xff] %v2788_v7 }
 0x1b7   : > { %2803 = vst [vmem:[%s4743_s13 + $0x70] sm:$0xff] %v2787_v42 }
 0x1b8   : > { %3735 = shalt.err (!%p3732_p6)
}
 0x1b9   : > { %s3736_s11 = scalar_lea.hbm %s4810_s5, 2048  ;;  %s3740_s23 = scalar_lea.hbm %s4874_s4, 8192 }
 0x1ba   : > { %p3737_p7 = scmp.ne.s32.totalorder %s4810_s5, %s3736_s11  ;;  %p3741_p11 = scmp.lt.s32.totalorder %s4810_s5, %s4874_s4 }
 0x1bb   : > { %p3742_p12 = scmp.lt.s32.totalorder %s3740_s23, %s3736_s11 }
 0x1bc   : > { %p3738_p9 = pnand %p3737_p7, %p3895_p3 }
 0x1bd   : > { %p3743_p13 = por %p3742_p12, %p3741_p11 }
 0x1be   : > { %p3739_p10 = pneg %p3738_p9 }
 0x1c0   : > { %p3744_p0 = pnand %p3743_p13, %p3739_p10 }
 0x1c2   : > { %3747 = shalt.err (!%p3744_p0)
}
 0x1c3   : > { %s3817_s18 = smov 128   ;;  %s3818_s19 = smov 8  }
 0x1c4   : > { %3585 = dma.vmem_to_hbm [thread:$0]  (%p3895_p3), %s4812_s30, 2048, %s4810_s5, %s4819_s6, %s3817_s18, %s3817_s18, %s3818_s19  }
 0x1c5 PF: > { %p3591_p1 = scmp.ge.s32.totalorder %s3814_s22, 2  ;;  %s2837_s8 = sand.u32 1, %s3786_s15  }
 0x1c6   : > { %s2838_s9 = scalar_lea.sflag [#allocation4], %s2837_s8 }
 0x1c7   : > { %p3588_p2 = pnand %p3591_p1, %p3904_p8 }
 0x1c9   : > { %p3589_p4 = pneg %p3588_p2 }
 0x1cb   : > { %3781 = dma.done.wait (%p3589_p4), %s2838_s9, 2048  }
 0x1cc   : > { %3783 = vsyncadd (%p3589_p4), %s2838_s9, 4294965248  ;;  %s17_s22 = sadd.s32 1, %s3814_s22   ;;  %s4905_s15 = smov %s3790_s16 }
 0x1cd   : > { %p14_p5 = scmp.ge.s32.totalorder %s17_s22, 6   ;;  %s4906_s16 = smov %s3794_s17 }
 0x1ce   : > { %s4907_s17 = smov %s3913_s7  ;;  %s4908_s18 = smov %s3806_s20 }
 0x1cf   : > { %s4909_s19 = smov %s3810_s21  ;;  %s4910_s20 = smov %s4913_s25 }
 0x1d0   : > { %s4911_s21 = smov %s4917_s26  ;;  %16 = sbr.rel (!%p14_p5) target bundleno = 5 (0x5), region = 82 }
 0x1d5   :  { %2843 = vsyncpa [#allocation4], 1 }
 0x1d6   :  { %2845 = vsyncpa [#allocation4 + $0x1], 1 }

</bundles_post_ra>
